<compile_context>
chip_gen: v7x
topology: tpu7x:2x2x1
jax: 0.10.0
libtpu: 0.0.40
codegen_flags: <defaults>
</compile_context>

<pallas_src>
import functools

import numpy as np
import jax
import jax.numpy as jnp
from jax import lax
from jax.experimental import pallas as pl
from jax.experimental.pallas import tpu as pltpu


def _gru_fc_kernel(x_ref,        # [CHUNK, E]  bf16  packed embedded tokens (this chunk)
                   w_i_ref,      # [E, 3*Hp]   bf16  fused input->gate weights (r|n|z), lane-padded
                   w_h_ref,      # [Hp, 3*Hp]  bf16  fused hidden->gate weights (r|n|z), lane-padded
                   b_i_ref,      # [1, 3*Hp]   f32   fused biases (b_ir+b_hr | b_in | b_iz+b_hz)
                   b_hn_ref,     # [1, Hp]     f32   hidden-side n-gate bias (kept inside r*)
                   w_fc_ref,     # [Hp, O]     bf16
                   b_fc_ref,     # [1, O]      f32
                   out_ref,      # [1, O]      f32   (resident; written on last chunk only)
                   h_ref,        # scratch [1, Hp]       f32  persistent hidden state
                   xall_ref,     # scratch [CHUNK, 3*Hp] f32  per-chunk gate pre-activations
                   *, n_valid, hp):
    chunk = x_ref.shape[0]                         # static, multiple of 16
    c = pl.program_id(0)

    # First chunk: zero the persistent hidden state.
    @pl.when(c == 0)
    def _():
        h_ref[...] = jnp.zeros_like(h_ref)

    # Hot path 1: input-side gate pre-activations for this whole chunk, one
    # bf16 MXU pass, f32 accumulation.  No bias add here (folded per-step).
    xall_ref[...] = jnp.dot(x_ref[...], w_i_ref[...],
                            preferred_element_type=jnp.float32)

    # Residents, hoisted out of the recurrence.
    w_h = w_h_ref[...]                             # bf16 [Hp, 3*Hp]
    b_all = b_i_ref[...]                           # f32  [1, 3*Hp]  (r|n|z)
    b_r = b_all[:, 0:hp]
    b_n = b_all[:, hp:2 * hp]
    b_z = b_all[:, 2 * hp:3 * hp]
    b_hn = b_hn_ref[...]                           # f32  [1, Hp]

    base = c * chunk                               # global row offset of this chunk

    # Hot path 2: strictly serial GRU recurrence (latency-bound).  h stays in
    # vregs (f32); only the matmul operands are cast to bf16.  Each window
    # does one dense [8, 3*Hp] slab load and 8 statically unrolled steps.
    def window(w, h):
        start = pl.multiple_of(w * 8, 8)
        slab = xall_ref[pl.ds(start, 8), :]        # [8, 3*Hp] f32, one vld
        t0 = base + w * 8
        for i in range(8):                         # statically unrolled
            xg = slab[i:i + 1, :]                  # in-register row split
            gh = jnp.dot(h.astype(jnp.bfloat16), w_h,
                         preferred_element_type=jnp.float32)      # [1, 3*Hp]
            r = jax.nn.sigmoid(xg[:, 0:hp] + gh[:, 0:hp] + b_r)
            n = jnp.tanh(xg[:, hp:2 * hp] + b_n + r * (gh[:, hp:2 * hp] + b_hn))
            z = jax.nn.sigmoid(xg[:, 2 * hp:3 * hp] + gh[:, 2 * hp:3 * hp] + b_z)
            h_new = (1.0 - z) * n + z * h
            # Mask the zero-padded tail rows (cheap select in VALU slack).
            h = jnp.where(t0 + i < n_valid, h_new, h)
        return h

    h = lax.fori_loop(0, chunk // 8, window, h_ref[...])
    h_ref[...] = h

    # Hot path 3: final Linear on the last hidden state (padded h lanes are 0
    # and padded w_fc rows are 0, so no slicing needed).
    @pl.when(c == pl.num_programs(0) - 1)
    def _():
        out_ref[...] = (jnp.dot(h.astype(jnp.bfloat16), w_fc_ref[...],
                                preferred_element_type=jnp.float32)
                        + b_fc_ref[...])


def init_params(key, input_dim, embedding_dim, hidden_dim, output_dim):
    """Deterministic, PyTorch-shaped parameters (PyTorch gate row order r|z|n)."""
    ks = jax.random.split(key, 7)
    s = 1.0 / np.sqrt(hidden_dim)
    return dict(
        embedding=jax.random.normal(ks[0], (input_dim, embedding_dim), jnp.float32),
        w_ih=jax.random.uniform(ks[1], (3 * hidden_dim, embedding_dim), jnp.float32, -s, s),
        w_hh=jax.random.uniform(ks[2], (3 * hidden_dim, hidden_dim), jnp.float32, -s, s),
        b_ih=jax.random.uniform(ks[3], (3 * hidden_dim,), jnp.float32, -s, s),
        b_hh=jax.random.uniform(ks[4], (3 * hidden_dim,), jnp.float32, -s, s),
        fc_w=jax.random.uniform(ks[5], (output_dim, hidden_dim), jnp.float32, -s, s),
        fc_b=jax.random.uniform(ks[6], (output_dim,), jnp.float32, -s, s),
    )


def _pack_indices(T, B, lengths):
    # Same row order as torch pack_padded_sequence (lengths sorted descending).
    idx = [(t, b) for t in range(T) for b in range(B) if lengths[b] > t]
    return (np.array([p[0] for p in idx], np.int32),
            np.array([p[1] for p in idx], np.int32))


def _pad_cols(a, target):
    """Zero-pad the last axis of `a` up to `target`."""
    pad = target - a.shape[-1]
    if pad == 0:
        return a
    widths = [(0, 0)] * (a.ndim - 1) + [(0, pad)]
    return jnp.pad(a, widths)


def rnn_forward(text, text_length, params, *, max_chunk=512):
    T, B = text.shape
    lengths = np.asarray(text_length)
    # torch pack_padded_sequence(enforce_sorted=True) semantics.
    assert np.all(np.diff(lengths) <= 0), "text_length must be sorted descending"
    H = params["w_hh"].shape[1]
    O = params["fc_w"].shape[0]
    Hp = ((H + 127) // 128) * 128          # lane-dense gate width (>=128)

    # Glue (stays in XLA): embedding gather + pack_padded_sequence row order.
    # TODO(synk): the gather / packing is a data-dependent index build; kept
    # host/XLA-side (N and shapes are trace-time constants -> new lengths recompile).
    emb = params["embedding"][text]                      # [T, B, E]
    t_idx, b_idx = _pack_indices(T, B, lengths)
    packed = emb[t_idx, b_idx]                           # [N, E] f32
    N, E = packed.shape

    # N-chunked grid: VMEM stays O(CHUNK) regardless of N.  CHUNK is a multiple
    # of 16 so bf16 x blocks and the 8-step windows stay tile-aligned.
    CHUNK = min(max_chunk, ((N + 15) // 16) * 16)
    n_chunks = (N + CHUNK - 1) // CHUNK
    N_pad = n_chunks * CHUNK
    packed_p = jnp.pad(packed, ((0, N_pad - N), (0, 0))).astype(jnp.bfloat16)

    # Split GRU weights per gate, transpose to x @ W layout, zero-pad the gate
    # (lane) dimension to Hp, then fuse in r|n|z order (n drains before z).
    w_ih, w_hh = params["w_ih"], params["w_hh"]
    b_ih, b_hh = params["b_ih"], params["b_hh"]
    order = (0, 2, 1)                                    # PyTorch rows r|z|n -> fuse r|n|z
    w_i_gates = [w_ih[g * H:(g + 1) * H].T for g in order]           # [E, H] each
    w_h_gates = [w_hh[g * H:(g + 1) * H].T for g in order]           # [H, H] each
    w_i = jnp.concatenate([_pad_cols(w, Hp) for w in w_i_gates],
                          axis=1).astype(jnp.bfloat16)               # [E, 3*Hp]
    w_h = jnp.concatenate(
        [jnp.pad(_pad_cols(w, Hp), ((0, Hp - H), (0, 0))) for w in w_h_gates],
        axis=1).astype(jnp.bfloat16)                                 # [Hp, 3*Hp]

    # Biases: r and z fuse exactly (outside the nonlinearity); n keeps b_in
    # outside r* and b_hn inside r*.  Kept f32 (added post-matmul).
    b_r = b_ih[0:H] + b_hh[0:H]
    b_z = b_ih[H:2 * H] + b_hh[H:2 * H]
    b_n_in = b_ih[2 * H:3 * H]
    b_hn = b_hh[2 * H:3 * H]
    b_i = jnp.concatenate(
        [_pad_cols(b.reshape(1, H), Hp) for b in (b_r, b_n_in, b_z)], axis=1)  # [1, 3*Hp]
    b_hn_p = _pad_cols(b_hn.reshape(1, H), Hp)                                 # [1, Hp]

    # Final Linear: pad rows to Hp (padded h lanes are exactly zero).
    w_fc = jnp.pad(params["fc_w"].T, ((0, Hp - H), (0, 0))).astype(jnp.bfloat16)  # [Hp, O]
    b_fc = params["fc_b"].reshape(1, O).astype(jnp.float32)                       # [1, O]

    kernel = functools.partial(_gru_fc_kernel, n_valid=N, hp=Hp)

    def rep(a):
        return pl.BlockSpec(a.shape, lambda c: (0, 0))

    out = pl.pallas_call(
        kernel,
        out_shape=jax.ShapeDtypeStruct((1, O), jnp.float32),
        grid=(n_chunks,),
        in_specs=[pl.BlockSpec((CHUNK, E), lambda c: (c, 0)),
                  rep(w_i), rep(w_h), rep(b_i), rep(b_hn_p), rep(w_fc), rep(b_fc)],
        out_specs=pl.BlockSpec((1, O), lambda c: (0, 0)),
        scratch_shapes=[pltpu.VMEM((1, Hp), jnp.float32),          # persistent h
                        pltpu.VMEM((CHUNK, 3 * Hp), jnp.float32)], # per-chunk gate pre-acts
        compiler_params=pltpu.CompilerParams(
            dimension_semantics=("arbitrary",),        # recurrence is strictly serial
            vmem_limit_bytes=32 * 1024 * 1024),
    )(packed_p, w_i, w_h, b_i, b_hn_p, w_fc, b_fc)

    return out.reshape(-1)       # matches fc(hidden.squeeze(0)).view(-1)


def reference_forward(text, text_length, params):
    """Pure-JAX (f32) reference of the exact PyTorch forward semantics."""
    T, B = text.shape
    lengths = np.asarray(text_length)
    H = params["w_hh"].shape[1]
    emb = params["embedding"][text]
    t_idx, b_idx = _pack_indices(T, B, lengths)
    packed = emb[t_idx, b_idx]
    w_ih, w_hh, b_ih, b_hh = params["w_ih"], params["w_hh"], params["b_ih"], params["b_hh"]
    h = jnp.zeros((H,), jnp.float32)
    for x in np.asarray(packed):
        gi = w_ih @ x + b_ih
        gh = w_hh @ h + b_hh
        r = jax.nn.sigmoid(gi[:H] + gh[:H])
        z = jax.nn.sigmoid(gi[H:2 * H] + gh[H:2 * H])
        n = jnp.tanh(gi[2 * H:] + r * gh[2 * H:])
        h = (1.0 - z) * n + z * h
    return (params["fc_w"] @ h + params["fc_b"]).reshape(-1)


if __name__ == "__main__":
    # RNN(input_dim=50, embedding_dim=32, hidden_dim=32, output_dim=1)
    input_dim, embedding_dim, hidden_dim, output_dim = 50, 32, 32, 1
    seq_len, batch = 8, 2

    key = jax.random.PRNGKey(0)
    kp, kt = jax.random.split(key)
    params = init_params(kp, input_dim, embedding_dim, hidden_dim, output_dim)

    text = jax.random.randint(kt, (seq_len, batch), 0, input_dim, jnp.int32)  # [T, B]
    text_length = np.array([8, 5], dtype=np.int64)  # sorted descending (enforce_sorted=True)

    out = rnn_forward(text, text_length, params)
    out = jax.block_until_ready(out)

    ref = reference_forward(text, text_length, params)
    assert out.shape == (output_dim,), out.shape
    # bf16 MXU operands (f32 accumulation) vs. pure-f32 reference: loose tolerance.
    np.testing.assert_allclose(np.asarray(out), np.asarray(ref), rtol=3e-2, atol=3e-2)
    print("KERNEL_OK")
</pallas_src>

<mosaic_0001>
module attributes {stable_mosaic.version = 11 : i64} {
  func.func @_gru_fc_kernel(%arg0: i32, %arg1: memref<16x32xbf16, #tpu.memory_space<vmem>>, %arg2: memref<32x384xbf16, #tpu.memory_space<vmem>>, %arg3: memref<128x384xbf16, #tpu.memory_space<vmem>>, %arg4: memref<1x384xf32, #tpu.memory_space<vmem>>, %arg5: memref<1x128xf32, #tpu.memory_space<vmem>>, %arg6: memref<128x1xbf16, #tpu.memory_space<vmem>>, %arg7: memref<1x1xf32, #tpu.memory_space<vmem>>, %arg8: memref<1x1xf32, #tpu.memory_space<vmem>>, %arg9: memref<1x128xf32, #tpu.memory_space<vmem>>, %arg10: memref<16x384xf32, #tpu.memory_space<vmem>>) attributes {dimension_semantics = [#tpu.dimension_semantics<arbitrary>], iteration_bounds = array<i64: 1>, scalar_prefetch = 0 : i64, scratch_operands = 2 : i64, tpu.core_type = #tpu.core_type<tc>, window_params = [{transform_indices = @transform_0, window_bounds = array<i64: 16, 32>}, {pipeline_mode = #tpu.pipeline_mode<synchronous>, transform_indices = @transform_1, window_bounds = array<i64: 32, 384>}, {pipeline_mode = #tpu.pipeline_mode<synchronous>, transform_indices = @transform_2, window_bounds = array<i64: 128, 384>}, {pipeline_mode = #tpu.pipeline_mode<synchronous>, transform_indices = @transform_3, window_bounds = array<i64: 1, 384>}, {pipeline_mode = #tpu.pipeline_mode<synchronous>, transform_indices = @transform_4, window_bounds = array<i64: 1, 128>}, {pipeline_mode = #tpu.pipeline_mode<synchronous>, transform_indices = @transform_5, window_bounds = array<i64: 128, 1>}, {pipeline_mode = #tpu.pipeline_mode<synchronous>, transform_indices = @transform_6, window_bounds = array<i64: 1, 1>}, {pipeline_mode = #tpu.pipeline_mode<synchronous>, transform_indices = @transform_7, window_bounds = array<i64: 1, 1>}]} {
    %c0_i32 = arith.constant 0 : i32
    %0 = arith.cmpi eq, %arg0, %c0_i32 : i32
    %1 = arith.extui %0 : i1 to i32
    %c0_i32_0 = arith.constant 0 : i32
    %2 = arith.cmpi ne, %1, %c0_i32_0 : i32
    scf.if %2 {
      %cst_20 = arith.constant 0.000000e+00 : f32
      %21 = vector.broadcast %cst_20 : f32 to vector<1x128xf32>
      %c0_21 = arith.constant 0 : index
      %c0_22 = arith.constant 0 : index
      %22 = vector.load %arg9[%c0_21, %c0_22] : memref<1x128xf32, #tpu.memory_space<vmem>>, vector<1x128xf32>
      tpu.vector_store %arg9[%c0_21, %c0_22], %21 {strides = array<i32>} : memref<1x128xf32, #tpu.memory_space<vmem>>, vector<1x128xf32>,
    } else {
    }
    %c0 = arith.constant 0 : index
    %c0_1 = arith.constant 0 : index
    %3 = vector.load %arg1[%c0, %c0_1] : memref<16x32xbf16, #tpu.memory_space<vmem>>, vector<16x32xbf16>
    %c0_2 = arith.constant 0 : index
    %c0_3 = arith.constant 0 : index
    %4 = vector.load %arg2[%c0_2, %c0_3] : memref<32x384xbf16, #tpu.memory_space<vmem>>, vector<32x384xbf16>
    %cst = arith.constant dense<0.000000e+00> : vector<16x384xf32>
    %5 = tpu.matmul %3, %4, %cst {dimension_numbers = #tpu.dot_dimension_numbers<[1], [0], [0], [1], [0, 0, 1, 1], [], []>} : vector<16x32xbf16>, vector<32x384xbf16>, vector<16x384xf32> -> vector<16x384xf32>
    %c0_4 = arith.constant 0 : index
    %c0_5 = arith.constant 0 : index
    %6 = vector.load %arg10[%c0_4, %c0_5] : memref<16x384xf32, #tpu.memory_space<vmem>>, vector<16x384xf32>
    tpu.vector_store %arg10[%c0_4, %c0_5], %5 {strides = array<i32>} : memref<16x384xf32, #tpu.memory_space<vmem>>, vector<16x384xf32>,
    %c0_6 = arith.constant 0 : index
    %c0_7 = arith.constant 0 : index
    %7 = vector.load %arg3[%c0_6, %c0_7] : memref<128x384xbf16, #tpu.memory_space<vmem>>, vector<128x384xbf16>
    %c0_8 = arith.constant 0 : index
    %c0_9 = arith.constant 0 : index
    %8 = vector.load %arg4[%c0_8, %c0_9] : memref<1x384xf32, #tpu.memory_space<vmem>>, vector<1x384xf32>
    %9 = vector.extract_strided_slice %8 {offsets = [0, 0], sizes = [1, 128], strides = [1, 1]} : vector<1x384xf32> to vector<1x128xf32>
    %10 = vector.extract_strided_slice %8 {offsets = [0, 128], sizes = [1, 128], strides = [1, 1]} : vector<1x384xf32> to vector<1x128xf32>
    %11 = vector.extract_strided_slice %8 {offsets = [0, 256], sizes = [1, 128], strides = [1, 1]} : vector<1x384xf32> to vector<1x128xf32>
    %c0_10 = arith.constant 0 : index
    %c0_11 = arith.constant 0 : index
    %12 = vector.load %arg5[%c0_10, %c0_11] : memref<1x128xf32, #tpu.memory_space<vmem>>, vector<1x128xf32>
    %c16_i32 = arith.constant 16 : i32
    %13 = arith.muli %arg0, %c16_i32 : i32
    %c0_12 = arith.constant 0 : index
    %c0_13 = arith.constant 0 : index
    %14 = vector.load %arg9[%c0_12, %c0_13] : memref<1x128xf32, #tpu.memory_space<vmem>>, vector<1x128xf32>
    %c0_i32_14 = arith.constant 0 : i32
    %c2_i32 = arith.constant 2 : i32
    %15 = arith.addi %c0_i32_14, %c2_i32 : i32
    %c1_i32 = arith.constant 1 : i32
    %16 = scf.for %arg11 = %c0_i32_14 to %15 step %c1_i32 iter_args(%arg12 = %14) -> (vector<1x128xf32>)  : i32 {
      %c8_i32 = arith.constant 8 : i32
      %21 = arith.muli %arg11, %c8_i32 : i32
      %22 = tpu.assume_multiple %21, 8 : i32
      %23 = arith.index_cast %22 : i32 to index
      %c0_20 = arith.constant 0 : index
      %24 = vector.load %arg10[%23, %c0_20] : memref<16x384xf32, #tpu.memory_space<vmem>>, vector<8x384xf32>
      %c8_i32_21 = arith.constant 8 : i32
      %25 = arith.muli %arg11, %c8_i32_21 : i32
      %26 = arith.addi %13, %25 : i32
      %27 = vector.extract_strided_slice %24 {offsets = [0, 0], sizes = [1, 384], strides = [1, 1]} : vector<8x384xf32> to vector<1x384xf32>
      %28 = arith.truncf %arg12 : vector<1x128xf32> to vector<1x128xbf16>
      %cst_22 = arith.constant dense<0.000000e+00> : vector<1x384xf32>
      %29 = tpu.matmul %28, %7, %cst_22 {dimension_numbers = #tpu.dot_dimension_numbers<[1], [0], [0], [1], [0, 0, 1, 1], [], []>} : vector<1x128xbf16>, vector<128x384xbf16>, vector<1x384xf32> -> vector<1x384xf32>
      %30 = vector.extract_strided_slice %27 {offsets = [0, 0], sizes = [1, 128], strides = [1, 1]} : vector<1x384xf32> to vector<1x128xf32>
      %31 = vector.extract_strided_slice %29 {offsets = [0, 0], sizes = [1, 128], strides = [1, 1]} : vector<1x384xf32> to vector<1x128xf32>
      %32 = arith.addf %30, %31 : vector<1x128xf32>
      %33 = arith.addf %32, %9 : vector<1x128xf32>
      %34 = arith.negf %33 : vector<1x128xf32>
      %35 = math.exp %34 : vector<1x128xf32>
      %cst_23 = arith.constant 1.000000e+00 : f32
      %36 = vector.broadcast %cst_23 : f32 to vector<1x128xf32>
      %37 = arith.addf %36, %35 : vector<1x128xf32>
      %38 = arith.divf %36, %37 : vector<1x128xf32>
      %39 = vector.extract_strided_slice %27 {offsets = [0, 128], sizes = [1, 128], strides = [1, 1]} : vector<1x384xf32> to vector<1x128xf32>
      %40 = arith.addf %39, %10 : vector<1x128xf32>
      %41 = vector.extract_strided_slice %29 {offsets = [0, 128], sizes = [1, 128], strides = [1, 1]} : vector<1x384xf32> to vector<1x128xf32>
      %42 = arith.addf %41, %12 : vector<1x128xf32>
      %43 = arith.mulf %38, %42 : vector<1x128xf32>
      %44 = arith.addf %40, %43 : vector<1x128xf32>
      %45 = math.tanh %44 : vector<1x128xf32>
      %46 = vector.extract_strided_slice %27 {offsets = [0, 256], sizes = [1, 128], strides = [1, 1]} : vector<1x384xf32> to vector<1x128xf32>
      %47 = vector.extract_strided_slice %29 {offsets = [0, 256], sizes = [1, 128], strides = [1, 1]} : vector<1x384xf32> to vector<1x128xf32>
      %48 = arith.addf %46, %47 : vector<1x128xf32>
      %49 = arith.addf %48, %11 : vector<1x128xf32>
      %50 = arith.negf %49 : vector<1x128xf32>
      %51 = math.exp %50 : vector<1x128xf32>
      %cst_24 = arith.constant 1.000000e+00 : f32
      %52 = vector.broadcast %cst_24 : f32 to vector<1x128xf32>
      %53 = arith.addf %52, %51 : vector<1x128xf32>
      %54 = arith.divf %52, %53 : vector<1x128xf32>
      %cst_25 = arith.constant 1.000000e+00 : f32
      %55 = vector.broadcast %cst_25 : f32 to vector<1x128xf32>
      %56 = arith.subf %55, %54 : vector<1x128xf32>
      %57 = arith.mulf %56, %45 : vector<1x128xf32>
      %58 = arith.mulf %54, %arg12 : vector<1x128xf32>
      %59 = arith.addf %57, %58 : vector<1x128xf32>
      %c0_i32_26 = arith.constant 0 : i32
      %60 = arith.addi %26, %c0_i32_26 : i32
      %c13_i32 = arith.constant 13 : i32
      %61 = arith.cmpi slt, %60, %c13_i32 : i32
      %62 = arith.select %61, %59, %arg12 : vector<1x128xf32>
      %63 = vector.extract_strided_slice %24 {offsets = [1, 0], sizes = [1, 384], strides = [1, 1]} : vector<8x384xf32> to vector<1x384xf32>
      %64 = arith.truncf %62 : vector<1x128xf32> to vector<1x128xbf16>
      %cst_27 = arith.constant dense<0.000000e+00> : vector<1x384xf32>
      %65 = tpu.matmul %64, %7, %cst_27 {dimension_numbers = #tpu.dot_dimension_numbers<[1], [0], [0], [1], [0, 0, 1, 1], [], []>} : vector<1x128xbf16>, vector<128x384xbf16>, vector<1x384xf32> -> vector<1x384xf32>
      %66 = vector.extract_strided_slice %63 {offsets = [0, 0], sizes = [1, 128], strides = [1, 1]} : vector<1x384xf32> to vector<1x128xf32>
      %67 = vector.extract_strided_slice %65 {offsets = [0, 0], sizes = [1, 128], strides = [1, 1]} : vector<1x384xf32> to vector<1x128xf32>
      %68 = arith.addf %66, %67 : vector<1x128xf32>
      %69 = arith.addf %68, %9 : vector<1x128xf32>
      %70 = arith.negf %69 : vector<1x128xf32>
      %71 = math.exp %70 : vector<1x128xf32>
      %cst_28 = arith.constant 1.000000e+00 : f32
      %72 = vector.broadcast %cst_28 : f32 to vector<1x128xf32>
      %73 = arith.addf %72, %71 : vector<1x128xf32>
      %74 = arith.divf %72, %73 : vector<1x128xf32>
      %75 = vector.extract_strided_slice %63 {offsets = [0, 128], sizes = [1, 128], strides = [1, 1]} : vector<1x384xf32> to vector<1x128xf32>
      %76 = arith.addf %75, %10 : vector<1x128xf32>
      %77 = vector.extract_strided_slice %65 {offsets = [0, 128], sizes = [1, 128], strides = [1, 1]} : vector<1x384xf32> to vector<1x128xf32>
      %78 = arith.addf %77, %12 : vector<1x128xf32>
      %79 = arith.mulf %74, %78 : vector<1x128xf32>
      %80 = arith.addf %76, %79 : vector<1x128xf32>
      %81 = math.tanh %80 : vector<1x128xf32>
      %82 = vector.extract_strided_slice %63 {offsets = [0, 256], sizes = [1, 128], strides = [1, 1]} : vector<1x384xf32> to vector<1x128xf32>
      %83 = vector.extract_strided_slice %65 {offsets = [0, 256], sizes = [1, 128], strides = [1, 1]} : vector<1x384xf32> to vector<1x128xf32>
      %84 = arith.addf %82, %83 : vector<1x128xf32>
      %85 = arith.addf %84, %11 : vector<1x128xf32>
      %86 = arith.negf %85 : vector<1x128xf32>
      %87 = math.exp %86 : vector<1x128xf32>
      %cst_29 = arith.constant 1.000000e+00 : f32
      %88 = vector.broadcast %cst_29 : f32 to vector<1x128xf32>
      %89 = arith.addf %88, %87 : vector<1x128xf32>
      %90 = arith.divf %88, %89 : vector<1x128xf32>
      %cst_30 = arith.constant 1.000000e+00 : f32
      %91 = vector.broadcast %cst_30 : f32 to vector<1x128xf32>
      %92 = arith.subf %91, %90 : vector<1x128xf32>
      %93 = arith.mulf %92, %81 : vector<1x128xf32>
      %94 = arith.mulf %90, %62 : vector<1x128xf32>
      %95 = arith.addf %93, %94 : vector<1x128xf32>
      %c1_i32_31 = arith.constant 1 : i32
      %96 = arith.addi %26, %c1_i32_31 : i32
      %c13_i32_32 = arith.constant 13 : i32
      %97 = arith.cmpi slt, %96, %c13_i32_32 : i32
      %98 = arith.select %97, %95, %62 : vector<1x128xf32>
      %99 = vector.extract_strided_slice %24 {offsets = [2, 0], sizes = [1, 384], strides = [1, 1]} : vector<8x384xf32> to vector<1x384xf32>
      %100 = arith.truncf %98 : vector<1x128xf32> to vector<1x128xbf16>
      %cst_33 = arith.constant dense<0.000000e+00> : vector<1x384xf32>
      %101 = tpu.matmul %100, %7, %cst_33 {dimension_numbers = #tpu.dot_dimension_numbers<[1], [0], [0], [1], [0, 0, 1, 1], [], []>} : vector<1x128xbf16>, vector<128x384xbf16>, vector<1x384xf32> -> vector<1x384xf32>
      %102 = vector.extract_strided_slice %99 {offsets = [0, 0], sizes = [1, 128], strides = [1, 1]} : vector<1x384xf32> to vector<1x128xf32>
      %103 = vector.extract_strided_slice %101 {offsets = [0, 0], sizes = [1, 128], strides = [1, 1]} : vector<1x384xf32> to vector<1x128xf32>
      %104 = arith.addf %102, %103 : vector<1x128xf32>
      %105 = arith.addf %104, %9 : vector<1x128xf32>
      %106 = arith.negf %105 : vector<1x128xf32>
      %107 = math.exp %106 : vector<1x128xf32>
      %cst_34 = arith.constant 1.000000e+00 : f32
      %108 = vector.broadcast %cst_34 : f32 to vector<1x128xf32>
      %109 = arith.addf %108, %107 : vector<1x128xf32>
      %110 = arith.divf %108, %109 : vector<1x128xf32>
      %111 = vector.extract_strided_slice %99 {offsets = [0, 128], sizes = [1, 128], strides = [1, 1]} : vector<1x384xf32> to vector<1x128xf32>
      %112 = arith.addf %111, %10 : vector<1x128xf32>
      %113 = vector.extract_strided_slice %101 {offsets = [0, 128], sizes = [1, 128], strides = [1, 1]} : vector<1x384xf32> to vector<1x128xf32>
      %114 = arith.addf %113, %12 : vector<1x128xf32>
      %115 = arith.mulf %110, %114 : vector<1x128xf32>
      %116 = arith.addf %112, %115 : vector<1x128xf32>
      %117 = math.tanh %116 : vector<1x128xf32>
      %118 = vector.extract_strided_slice %99 {offsets = [0, 256], sizes = [1, 128], strides = [1, 1]} : vector<1x384xf32> to vector<1x128xf32>
      %119 = vector.extract_strided_slice %101 {offsets = [0, 256], sizes = [1, 128], strides = [1, 1]} : vector<1x384xf32> to vector<1x128xf32>
      %120 = arith.addf %118, %119 : vector<1x128xf32>
      %121 = arith.addf %120, %11 : vector<1x128xf32>
      %122 = arith.negf %121 : vector<1x128xf32>
      %123 = math.exp %122 : vector<1x128xf32>
      %cst_35 = arith.constant 1.000000e+00 : f32
      %124 = vector.broadcast %cst_35 : f32 to vector<1x128xf32>
      %125 = arith.addf %124, %123 : vector<1x128xf32>
      %126 = arith.divf %124, %125 : vector<1x128xf32>
      %cst_36 = arith.constant 1.000000e+00 : f32
      %127 = vector.broadcast %cst_36 : f32 to vector<1x128xf32>
      %128 = arith.subf %127, %126 : vector<1x128xf32>
      %129 = arith.mulf %128, %117 : vector<1x128xf32>
      %130 = arith.mulf %126, %98 : vector<1x128xf32>
      %131 = arith.addf %129, %130 : vector<1x128xf32>
      %c2_i32_37 = arith.constant 2 : i32
      %132 = arith.addi %26, %c2_i32_37 : i32
      %c13_i32_38 = arith.constant 13 : i32
      %133 = arith.cmpi slt, %132, %c13_i32_38 : i32
      %134 = arith.select %133, %131, %98 : vector<1x128xf32>
      %135 = vector.extract_strided_slice %24 {offsets = [3, 0], sizes = [1, 384], strides = [1, 1]} : vector<8x384xf32> to vector<1x384xf32>
      %136 = arith.truncf %134 : vector<1x128xf32> to vector<1x128xbf16>
      %cst_39 = arith.constant dense<0.000000e+00> : vector<1x384xf32>
      %137 = tpu.matmul %136, %7, %cst_39 {dimension_numbers = #tpu.dot_dimension_numbers<[1], [0], [0], [1], [0, 0, 1, 1], [], []>} : vector<1x128xbf16>, vector<128x384xbf16>, vector<1x384xf32> -> vector<1x384xf32>
      %138 = vector.extract_strided_slice %135 {offsets = [0, 0], sizes = [1, 128], strides = [1, 1]} : vector<1x384xf32> to vector<1x128xf32>
      %139 = vector.extract_strided_slice %137 {offsets = [0, 0], sizes = [1, 128], strides = [1, 1]} : vector<1x384xf32> to vector<1x128xf32>
      %140 = arith.addf %138, %139 : vector<1x128xf32>
      %141 = arith.addf %140, %9 : vector<1x128xf32>
      %142 = arith.negf %141 : vector<1x128xf32>
      %143 = math.exp %142 : vector<1x128xf32>
      %cst_40 = arith.constant 1.000000e+00 : f32
      %144 = vector.broadcast %cst_40 : f32 to vector<1x128xf32>
      %145 = arith.addf %144, %143 : vector<1x128xf32>
      %146 = arith.divf %144, %145 : vector<1x128xf32>
      %147 = vector.extract_strided_slice %135 {offsets = [0, 128], sizes = [1, 128], strides = [1, 1]} : vector<1x384xf32> to vector<1x128xf32>
      %148 = arith.addf %147, %10 : vector<1x128xf32>
      %149 = vector.extract_strided_slice %137 {offsets = [0, 128], sizes = [1, 128], strides = [1, 1]} : vector<1x384xf32> to vector<1x128xf32>
      %150 = arith.addf %149, %12 : vector<1x128xf32>
      %151 = arith.mulf %146, %150 : vector<1x128xf32>
      %152 = arith.addf %148, %151 : vector<1x128xf32>
      %153 = math.tanh %152 : vector<1x128xf32>
      %154 = vector.extract_strided_slice %135 {offsets = [0, 256], sizes = [1, 128], strides = [1, 1]} : vector<1x384xf32> to vector<1x128xf32>
      %155 = vector.extract_strided_slice %137 {offsets = [0, 256], sizes = [1, 128], strides = [1, 1]} : vector<1x384xf32> to vector<1x128xf32>
      %156 = arith.addf %154, %155 : vector<1x128xf32>
      %157 = arith.addf %156, %11 : vector<1x128xf32>
      %158 = arith.negf %157 : vector<1x128xf32>
      %159 = math.exp %158 : vector<1x128xf32>
      %cst_41 = arith.constant 1.000000e+00 : f32
      %160 = vector.broadcast %cst_41 : f32 to vector<1x128xf32>
      %161 = arith.addf %160, %159 : vector<1x128xf32>
      %162 = arith.divf %160, %161 : vector<1x128xf32>
      %cst_42 = arith.constant 1.000000e+00 : f32
      %163 = vector.broadcast %cst_42 : f32 to vector<1x128xf32>
      %164 = arith.subf %163, %162 : vector<1x128xf32>
      %165 = arith.mulf %164, %153 : vector<1x128xf32>
      %166 = arith.mulf %162, %134 : vector<1x128xf32>
      %167 = arith.addf %165, %166 : vector<1x128xf32>
      %c3_i32 = arith.constant 3 : i32
      %168 = arith.addi %26, %c3_i32 : i32
      %c13_i32_43 = arith.constant 13 : i32
      %169 = arith.cmpi slt, %168, %c13_i32_43 : i32
      %170 = arith.select %169, %167, %134 : vector<1x128xf32>
      %171 = vector.extract_strided_slice %24 {offsets = [4, 0], sizes = [1, 384], strides = [1, 1]} : vector<8x384xf32> to vector<1x384xf32>
      %172 = arith.truncf %170 : vector<1x128xf32> to vector<1x128xbf16>
      %cst_44 = arith.constant dense<0.000000e+00> : vector<1x384xf32>
      %173 = tpu.matmul %172, %7, %cst_44 {dimension_numbers = #tpu.dot_dimension_numbers<[1], [0], [0], [1], [0, 0, 1, 1], [], []>} : vector<1x128xbf16>, vector<128x384xbf16>, vector<1x384xf32> -> vector<1x384xf32>
      %174 = vector.extract_strided_slice %171 {offsets = [0, 0], sizes = [1, 128], strides = [1, 1]} : vector<1x384xf32> to vector<1x128xf32>
      %175 = vector.extract_strided_slice %173 {offsets = [0, 0], sizes = [1, 128], strides = [1, 1]} : vector<1x384xf32> to vector<1x128xf32>
      %176 = arith.addf %174, %175 : vector<1x128xf32>
      %177 = arith.addf %176, %9 : vector<1x128xf32>
      %178 = arith.negf %177 : vector<1x128xf32>
      %179 = math.exp %178 : vector<1x128xf32>
      %cst_45 = arith.constant 1.000000e+00 : f32
      %180 = vector.broadcast %cst_45 : f32 to vector<1x128xf32>
      %181 = arith.addf %180, %179 : vector<1x128xf32>
      %182 = arith.divf %180, %181 : vector<1x128xf32>
      %183 = vector.extract_strided_slice %171 {offsets = [0, 128], sizes = [1, 128], strides = [1, 1]} : vector<1x384xf32> to vector<1x128xf32>
      %184 = arith.addf %183, %10 : vector<1x128xf32>
      %185 = vector.extract_strided_slice %173 {offsets = [0, 128], sizes = [1, 128], strides = [1, 1]} : vector<1x384xf32> to vector<1x128xf32>
      %186 = arith.addf %185, %12 : vector<1x128xf32>
      %187 = arith.mulf %182, %186 : vector<1x128xf32>
      %188 = arith.addf %184, %187 : vector<1x128xf32>
      %189 = math.tanh %188 : vector<1x128xf32>
      %190 = vector.extract_strided_slice %171 {offsets = [0, 256], sizes = [1, 128], strides = [1, 1]} : vector<1x384xf32> to vector<1x128xf32>
      %191 = vector.extract_strided_slice %173 {offsets = [0, 256], sizes = [1, 128], strides = [1, 1]} : vector<1x384xf32> to vector<1x128xf32>
      %192 = arith.addf %190, %191 : vector<1x128xf32>
      %193 = arith.addf %192, %11 : vector<1x128xf32>
      %194 = arith.negf %193 : vector<1x128xf32>
      %195 = math.exp %194 : vector<1x128xf32>
      %cst_46 = arith.constant 1.000000e+00 : f32
      %196 = vector.broadcast %cst_46 : f32 to vector<1x128xf32>
      %197 = arith.addf %196, %195 : vector<1x128xf32>
      %198 = arith.divf %196, %197 : vector<1x128xf32>
      %cst_47 = arith.constant 1.000000e+00 : f32
      %199 = vector.broadcast %cst_47 : f32 to vector<1x128xf32>
      %200 = arith.subf %199, %198 : vector<1x128xf32>
      %201 = arith.mulf %200, %189 : vector<1x128xf32>
      %202 = arith.mulf %198, %170 : vector<1x128xf32>
      %203 = arith.addf %201, %202 : vector<1x128xf32>
      %c4_i32 = arith.constant 4 : i32
      %204 = arith.addi %26, %c4_i32 : i32
      %c13_i32_48 = arith.constant 13 : i32
      %205 = arith.cmpi slt, %204, %c13_i32_48 : i32
      %206 = arith.select %205, %203, %170 : vector<1x128xf32>
      %207 = vector.extract_strided_slice %24 {offsets = [5, 0], sizes = [1, 384], strides = [1, 1]} : vector<8x384xf32> to vector<1x384xf32>
      %208 = arith.truncf %206 : vector<1x128xf32> to vector<1x128xbf16>
      %cst_49 = arith.constant dense<0.000000e+00> : vector<1x384xf32>
      %209 = tpu.matmul %208, %7, %cst_49 {dimension_numbers = #tpu.dot_dimension_numbers<[1], [0], [0], [1], [0, 0, 1, 1], [], []>} : vector<1x128xbf16>, vector<128x384xbf16>, vector<1x384xf32> -> vector<1x384xf32>
      %210 = vector.extract_strided_slice %207 {offsets = [0, 0], sizes = [1, 128], strides = [1, 1]} : vector<1x384xf32> to vector<1x128xf32>
      %211 = vector.extract_strided_slice %209 {offsets = [0, 0], sizes = [1, 128], strides = [1, 1]} : vector<1x384xf32> to vector<1x128xf32>
      %212 = arith.addf %210, %211 : vector<1x128xf32>
      %213 = arith.addf %212, %9 : vector<1x128xf32>
      %214 = arith.negf %213 : vector<1x128xf32>
      %215 = math.exp %214 : vector<1x128xf32>
      %cst_50 = arith.constant 1.000000e+00 : f32
      %216 = vector.broadcast %cst_50 : f32 to vector<1x128xf32>
      %217 = arith.addf %216, %215 : vector<1x128xf32>
      %218 = arith.divf %216, %217 : vector<1x128xf32>
      %219 = vector.extract_strided_slice %207 {offsets = [0, 128], sizes = [1, 128], strides = [1, 1]} : vector<1x384xf32> to vector<1x128xf32>
      %220 = arith.addf %219, %10 : vector<1x128xf32>
      %221 = vector.extract_strided_slice %209 {offsets = [0, 128], sizes = [1, 128], strides = [1, 1]} : vector<1x384xf32> to vector<1x128xf32>
      %222 = arith.addf %221, %12 : vector<1x128xf32>
      %223 = arith.mulf %218, %222 : vector<1x128xf32>
      %224 = arith.addf %220, %223 : vector<1x128xf32>
      %225 = math.tanh %224 : vector<1x128xf32>
      %226 = vector.extract_strided_slice %207 {offsets = [0, 256], sizes = [1, 128], strides = [1, 1]} : vector<1x384xf32> to vector<1x128xf32>
      %227 = vector.extract_strided_slice %209 {offsets = [0, 256], sizes = [1, 128], strides = [1, 1]} : vector<1x384xf32> to vector<1x128xf32>
      %228 = arith.addf %226, %227 : vector<1x128xf32>
      %229 = arith.addf %228, %11 : vector<1x128xf32>
      %230 = arith.negf %229 : vector<1x128xf32>
      %231 = math.exp %230 : vector<1x128xf32>
      %cst_51 = arith.constant 1.000000e+00 : f32
      %232 = vector.broadcast %cst_51 : f32 to vector<1x128xf32>
      %233 = arith.addf %232, %231 : vector<1x128xf32>
      %234 = arith.divf %232, %233 : vector<1x128xf32>
      %cst_52 = arith.constant 1.000000e+00 : f32
      %235 = vector.broadcast %cst_52 : f32 to vector<1x128xf32>
      %236 = arith.subf %235, %234 : vector<1x128xf32>
      %237 = arith.mulf %236, %225 : vector<1x128xf32>
      %238 = arith.mulf %234, %206 : vector<1x128xf32>
      %239 = arith.addf %237, %238 : vector<1x128xf32>
      %c5_i32 = arith.constant 5 : i32
      %240 = arith.addi %26, %c5_i32 : i32
      %c13_i32_53 = arith.constant 13 : i32
      %241 = arith.cmpi slt, %240, %c13_i32_53 : i32
      %242 = arith.select %241, %239, %206 : vector<1x128xf32>
      %243 = vector.extract_strided_slice %24 {offsets = [6, 0], sizes = [1, 384], strides = [1, 1]} : vector<8x384xf32> to vector<1x384xf32>
      %244 = arith.truncf %242 : vector<1x128xf32> to vector<1x128xbf16>
      %cst_54 = arith.constant dense<0.000000e+00> : vector<1x384xf32>
      %245 = tpu.matmul %244, %7, %cst_54 {dimension_numbers = #tpu.dot_dimension_numbers<[1], [0], [0], [1], [0, 0, 1, 1], [], []>} : vector<1x128xbf16>, vector<128x384xbf16>, vector<1x384xf32> -> vector<1x384xf32>
      %246 = vector.extract_strided_slice %243 {offsets = [0, 0], sizes = [1, 128], strides = [1, 1]} : vector<1x384xf32> to vector<1x128xf32>
      %247 = vector.extract_strided_slice %245 {offsets = [0, 0], sizes = [1, 128], strides = [1, 1]} : vector<1x384xf32> to vector<1x128xf32>
      %248 = arith.addf %246, %247 : vector<1x128xf32>
      %249 = arith.addf %248, %9 : vector<1x128xf32>
      %250 = arith.negf %249 : vector<1x128xf32>
      %251 = math.exp %250 : vector<1x128xf32>
      %cst_55 = arith.constant 1.000000e+00 : f32
      %252 = vector.broadcast %cst_55 : f32 to vector<1x128xf32>
      %253 = arith.addf %252, %251 : vector<1x128xf32>
      %254 = arith.divf %252, %253 : vector<1x128xf32>
      %255 = vector.extract_strided_slice %243 {offsets = [0, 128], sizes = [1, 128], strides = [1, 1]} : vector<1x384xf32> to vector<1x128xf32>
      %256 = arith.addf %255, %10 : vector<1x128xf32>
      %257 = vector.extract_strided_slice %245 {offsets = [0, 128], sizes = [1, 128], strides = [1, 1]} : vector<1x384xf32> to vector<1x128xf32>
      %258 = arith.addf %257, %12 : vector<1x128xf32>
      %259 = arith.mulf %254, %258 : vector<1x128xf32>
      %260 = arith.addf %256, %259 : vector<1x128xf32>
      %261 = math.tanh %260 : vector<1x128xf32>
      %262 = vector.extract_strided_slice %243 {offsets = [0, 256], sizes = [1, 128], strides = [1, 1]} : vector<1x384xf32> to vector<1x128xf32>
      %263 = vector.extract_strided_slice %245 {offsets = [0, 256], sizes = [1, 128], strides = [1, 1]} : vector<1x384xf32> to vector<1x128xf32>
      %264 = arith.addf %262, %263 : vector<1x128xf32>
      %265 = arith.addf %264, %11 : vector<1x128xf32>
      %266 = arith.negf %265 : vector<1x128xf32>
      %267 = math.exp %266 : vector<1x128xf32>
      %cst_56 = arith.constant 1.000000e+00 : f32
      %268 = vector.broadcast %cst_56 : f32 to vector<1x128xf32>
      %269 = arith.addf %268, %267 : vector<1x128xf32>
      %270 = arith.divf %268, %269 : vector<1x128xf32>
      %cst_57 = arith.constant 1.000000e+00 : f32
      %271 = vector.broadcast %cst_57 : f32 to vector<1x128xf32>
      %272 = arith.subf %271, %270 : vector<1x128xf32>
      %273 = arith.mulf %272, %261 : vector<1x128xf32>
      %274 = arith.mulf %270, %242 : vector<1x128xf32>
      %275 = arith.addf %273, %274 : vector<1x128xf32>
      %c6_i32 = arith.constant 6 : i32
      %276 = arith.addi %26, %c6_i32 : i32
      %c13_i32_58 = arith.constant 13 : i32
      %277 = arith.cmpi slt, %276, %c13_i32_58 : i32
      %278 = arith.select %277, %275, %242 : vector<1x128xf32>
      %279 = vector.extract_strided_slice %24 {offsets = [7, 0], sizes = [1, 384], strides = [1, 1]} : vector<8x384xf32> to vector<1x384xf32>
      %280 = arith.truncf %278 : vector<1x128xf32> to vector<1x128xbf16>
      %cst_59 = arith.constant dense<0.000000e+00> : vector<1x384xf32>
      %281 = tpu.matmul %280, %7, %cst_59 {dimension_numbers = #tpu.dot_dimension_numbers<[1], [0], [0], [1], [0, 0, 1, 1], [], []>} : vector<1x128xbf16>, vector<128x384xbf16>, vector<1x384xf32> -> vector<1x384xf32>
      %282 = vector.extract_strided_slice %279 {offsets = [0, 0], sizes = [1, 128], strides = [1, 1]} : vector<1x384xf32> to vector<1x128xf32>
      %283 = vector.extract_strided_slice %281 {offsets = [0, 0], sizes = [1, 128], strides = [1, 1]} : vector<1x384xf32> to vector<1x128xf32>
      %284 = arith.addf %282, %283 : vector<1x128xf32>
      %285 = arith.addf %284, %9 : vector<1x128xf32>
      %286 = arith.negf %285 : vector<1x128xf32>
      %287 = math.exp %286 : vector<1x128xf32>
      %cst_60 = arith.constant 1.000000e+00 : f32
      %288 = vector.broadcast %cst_60 : f32 to vector<1x128xf32>
      %289 = arith.addf %288, %287 : vector<1x128xf32>
      %290 = arith.divf %288, %289 : vector<1x128xf32>
      %291 = vector.extract_strided_slice %279 {offsets = [0, 128], sizes = [1, 128], strides = [1, 1]} : vector<1x384xf32> to vector<1x128xf32>
      %292 = arith.addf %291, %10 : vector<1x128xf32>
      %293 = vector.extract_strided_slice %281 {offsets = [0, 128], sizes = [1, 128], strides = [1, 1]} : vector<1x384xf32> to vector<1x128xf32>
      %294 = arith.addf %293, %12 : vector<1x128xf32>
      %295 = arith.mulf %290, %294 : vector<1x128xf32>
      %296 = arith.addf %292, %295 : vector<1x128xf32>
      %297 = math.tanh %296 : vector<1x128xf32>
      %298 = vector.extract_strided_slice %279 {offsets = [0, 256], sizes = [1, 128], strides = [1, 1]} : vector<1x384xf32> to vector<1x128xf32>
      %299 = vector.extract_strided_slice %281 {offsets = [0, 256], sizes = [1, 128], strides = [1, 1]} : vector<1x384xf32> to vector<1x128xf32>
      %300 = arith.addf %298, %299 : vector<1x128xf32>
      %301 = arith.addf %300, %11 : vector<1x128xf32>
      %302 = arith.negf %301 : vector<1x128xf32>
      %303 = math.exp %302 : vector<1x128xf32>
      %cst_61 = arith.constant 1.000000e+00 : f32
      %304 = vector.broadcast %cst_61 : f32 to vector<1x128xf32>
      %305 = arith.addf %304, %303 : vector<1x128xf32>
      %306 = arith.divf %304, %305 : vector<1x128xf32>
      %cst_62 = arith.constant 1.000000e+00 : f32
      %307 = vector.broadcast %cst_62 : f32 to vector<1x128xf32>
      %308 = arith.subf %307, %306 : vector<1x128xf32>
      %309 = arith.mulf %308, %297 : vector<1x128xf32>
      %310 = arith.mulf %306, %278 : vector<1x128xf32>
      %311 = arith.addf %309, %310 : vector<1x128xf32>
      %c7_i32 = arith.constant 7 : i32
      %312 = arith.addi %26, %c7_i32 : i32
      %c13_i32_63 = arith.constant 13 : i32
      %313 = arith.cmpi slt, %312, %c13_i32_63 : i32
      %314 = arith.select %313, %311, %278 : vector<1x128xf32>
      scf.yield %314 : vector<1x128xf32>
    }
    %c2_i32_15 = arith.constant 2 : i32
    %c0_16 = arith.constant 0 : index
    %c0_17 = arith.constant 0 : index
    %17 = vector.load %arg9[%c0_16, %c0_17] : memref<1x128xf32, #tpu.memory_space<vmem>>, vector<1x128xf32>
    tpu.vector_store %arg9[%c0_16, %c0_17], %16 {strides = array<i32>} : memref<1x128xf32, #tpu.memory_space<vmem>>, vector<1x128xf32>,
    %c0_i32_18 = arith.constant 0 : i32
    %18 = arith.cmpi eq, %arg0, %c0_i32_18 : i32
    %19 = arith.extui %18 : i1 to i32
    %c0_i32_19 = arith.constant 0 : i32
    %20 = arith.cmpi ne, %19, %c0_i32_19 : i32
    scf.if %20 {
      %21 = arith.truncf %16 : vector<1x128xf32> to vector<1x128xbf16>
      %c0_20 = arith.constant 0 : index
      %c0_21 = arith.constant 0 : index
      %22 = vector.load %arg6[%c0_20, %c0_21] : memref<128x1xbf16, #tpu.memory_space<vmem>>, vector<128x1xbf16>
      %cst_22 = arith.constant dense<0.000000e+00> : vector<1x1xf32>
      %23 = tpu.matmul %21, %22, %cst_22 {dimension_numbers = #tpu.dot_dimension_numbers<[1], [0], [0], [1], [0, 0, 1, 1], [], []>} : vector<1x128xbf16>, vector<128x1xbf16>, vector<1x1xf32> -> vector<1x1xf32>
      %c0_23 = arith.constant 0 : index
      %c0_24 = arith.constant 0 : index
      %24 = vector.load %arg7[%c0_23, %c0_24] : memref<1x1xf32, #tpu.memory_space<vmem>>, vector<1x1xf32>
      %25 = arith.addf %23, %24 : vector<1x1xf32>
      %c0_25 = arith.constant 0 : index
      %c0_26 = arith.constant 0 : index
      %26 = vector.load %arg8[%c0_25, %c0_26] : memref<1x1xf32, #tpu.memory_space<vmem>>, vector<1x1xf32>
      tpu.vector_store %arg8[%c0_25, %c0_26], %25 {strides = array<i32>} : memref<1x1xf32, #tpu.memory_space<vmem>>, vector<1x1xf32>,
    } else {
    }
    return
  }
  func.func @transform_0(%arg0: i32) -> (i32, i32) {
    %c0_i32 = arith.constant 0 : i32
    %c0_i32_0 = arith.constant 0 : i32
    return %arg0, %c0_i32 : i32, i32
  }
  func.func @transform_1(%arg0: i32) -> (i32, i32) {
    %c0_i32 = arith.constant 0 : i32
    %c0_i32_0 = arith.constant 0 : i32
    %c0_i32_1 = arith.constant 0 : i32
    return %c0_i32, %c0_i32_0 : i32, i32
  }
  func.func @transform_2(%arg0: i32) -> (i32, i32) {
    %c0_i32 = arith.constant 0 : i32
    %c0_i32_0 = arith.constant 0 : i32
    %c0_i32_1 = arith.constant 0 : i32
    return %c0_i32, %c0_i32_0 : i32, i32
  }
  func.func @transform_3(%arg0: i32) -> (i32, i32) {
    %c0_i32 = arith.constant 0 : i32
    %c0_i32_0 = arith.constant 0 : i32
    %c0_i32_1 = arith.constant 0 : i32
    return %c0_i32, %c0_i32_0 : i32, i32
  }
  func.func @transform_4(%arg0: i32) -> (i32, i32) {
    %c0_i32 = arith.constant 0 : i32
    %c0_i32_0 = arith.constant 0 : i32
    %c0_i32_1 = arith.constant 0 : i32
    return %c0_i32, %c0_i32_0 : i32, i32
  }
  func.func @transform_5(%arg0: i32) -> (i32, i32) {
    %c0_i32 = arith.constant 0 : i32
    %c0_i32_0 = arith.constant 0 : i32
    %c0_i32_1 = arith.constant 0 : i32
    return %c0_i32, %c0_i32_0 : i32, i32
  }
  func.func @transform_6(%arg0: i32) -> (i32, i32) {
    %c0_i32 = arith.constant 0 : i32
    %c0_i32_0 = arith.constant 0 : i32
    %c0_i32_1 = arith.constant 0 : i32
    return %c0_i32, %c0_i32_0 : i32, i32
  }
  func.func @transform_7(%arg0: i32) -> (i32, i32) {
    %c0_i32 = arith.constant 0 : i32
    %c0_i32_0 = arith.constant 0 : i32
    %c0_i32_1 = arith.constant 0 : i32
    return %c0_i32, %c0_i32_0 : i32, i32
  }
}

</mosaic_0001>

<bundles_post_ra>
// kernel: tpu_custom_call.1
= control target key start
LH: loop header
LB: loop body
LE: loop exit
PB: predicated region body
PF: predicated region fallthrough
CT: control target
= control target key end

     0   :  { %s2770_s0 = inlined_call_operand.vmem [shape: bf16[16,32], index: 0, kind: input, shape index: {}]   ;;  %s2771_s1 = inlined_call_operand.vmem [shape: bf16[32,384], index: 1, kind: input, shape index: {}]   ;;  %s2772_s2 = inlined_call_operand.hbm [shape: bf16[128,384], index: 2, kind: input, shape index: {}]   ;;  %s2773_s3 = inlined_call_operand.vmem [shape: f32[1,384], index: 3, kind: input, shape index: {}]   ;;  %s2774_s4 = inlined_call_operand.vmem [shape: f32[1,128], index: 4, kind: input, shape index: {}]   ;;  %s2775_s5 = inlined_call_operand.vmem [shape: bf16[128,1], index: 5, kind: input, shape index: {}]   ;;  %s2776_s6 = inlined_call_operand.<no memory space> [shape: f32[1,1], index: 6, kind: input, shape index: {}]   ;;  %s2777_s7 = inlined_call_operand.hbm [shape: f32[1,1], index: 7, kind: output, shape index: {}]  }
   0x1   :  { %v12_v0 = vstv %s2776_s6 }
   0x2   :  { %13 = vst [vmem:[#allocation4] sm:$0x1] %v12_v0 }
   0x3   :  { %14 = vsyncpa [#allocation6], 0 }
   0x4   :  { %15 = vsyncpa [#allocation7], 0  ;;  %s2051_s26 = smov [#allocation5]   ;;  %s1987_s30 = scalar_lea.hbm %s2772_s2, 3072 }
   0x5   :  { %s25_s27 = sshll.u32 %s2051_s26, 4  ;;  %p1988_p0 = scmp.ne.s32.totalorder %s2772_s2, %s1987_s30  ;;  %s26_s27 = int_to_ptr.vmem [resolvable:$true] %s25_s27 }
   0x6   :  { %p1991_p1 = scmp.lt.u32.totalorder %s1987_s30, %s2772_s2 }
   0x8   :  { %p1993_p2 = pnand %p1991_p1, %p1988_p0 }
   0xa   :  { %1996 = shalt.err (!%p1993_p2)
}
   0xb   :  { %s1997_s6 = scalar_lea.vmem %s26_s27, 3072  ;;  %p2002_p4 = scmp.lt.s32.totalorder %s26_s27, %s26_s27 }
   0xc   :  { %p1998_p3 = scmp.ne.s32.totalorder %s26_s27, %s1997_s6  ;;  %p2003_p5 = scmp.lt.s32.totalorder %s1997_s6, %s1997_s6 }
   0xe   :  { %p2004_p6 = por %p2003_p5, %p2002_p4 }
  0x10   :  { %p2005_p7 = pnand %p2004_p6, %p1998_p3 }
  0x12   :  { %2008 = shalt.err (!%p2005_p7)
}
  0x13   :  { %s2052_s12 = smov 192   ;;  %s2053_s13 = smov 12  }
  0x14   :  { %31 = dma.hbm_to_vmem [thread:$0]  %s2772_s2, 3072, %s26_s27, [#allocation6], %s2052_s12, %s2052_s12, %s2053_s13  }
  0x15   :  { %2039 = dma.done.wait [#allocation6], 3072  }
  0x16   :  { %2040 = vsyncadd [#allocation6], 4294964224  ;;  %v2778_v1 = vmov 0.0   ;;  %vm2055_vm0 = vmmov 0   ;;  %v2056_v2 = vmov 0   ;;  %v2120_v3 = vld [vmem:[#allocation5] sm:$0xff] }
  0x17   :  { %48 = vst [vmem:[#allocation2] sm:$0x1] %v2778_v1  ;;  %1674 = vmatprep.subr.bf16.mxu1 %v2778_v1  ;;  %1678 = vmatprep.mubr.msk.bf16.mxu1 %vm2055_vm0, %v2778_v1  ;;  %2793 = vst [vmem:[#allocation11_spill] sm:$0xff] %v2120_v3  ;;  %v2122_v4 = vld [vmem:[#allocation5 + $0x8] sm:$0xf]  ;;  %v2124_v5 = vld [vmem:[#allocation5 + $0xc] sm:$0xff] }
  0x18   :  { %132 = vmatprep.mubr.bf16.mxu0 %v2056_v2  ;;  %2794 = vst [vmem:[#allocation12_spill] sm:$0xff] %v2122_v4  ;;  %2795 = vst [vmem:[#allocation13_spill] sm:$0xff] %v2124_v5  ;;  %v2126_v6 = vld [vmem:[#allocation5 + $0x14] sm:$0xf]  ;;  %v2128_v7 = vld [vmem:[#allocation5 + $0x18] sm:$0xff]  ;;  %vm96_vm1 = vcmask 261120  }
  0x19   :  { %2796 = vst [vmem:[#allocation14_spill] sm:$0xff] %v2126_v6  ;;  %2797 = vst [vmem:[#allocation15_spill] sm:$0xff] %v2128_v7  ;;  %v2130_v8 = vld [vmem:[#allocation5 + $0x20] sm:$0xf]  ;;  %v2132_v9 = vld [vmem:[#allocation5 + $0x24] sm:$0xff] }
  0x1a   :  { %2798 = vst [vmem:[#allocation16_spill] sm:$0xff] %v2130_v8  ;;  %2799 = vst [vmem:[#allocation17_spill] sm:$0xff] %v2132_v9  ;;  %v2134_v10 = vld [vmem:[#allocation5 + $0x2c] sm:$0xf]  ;;  %v2136_v11 = vld [vmem:[#allocation5 + $0x30] sm:$0xff] }
  0x1b   :  { %2800 = vst [vmem:[#allocation18_spill] sm:$0xff] %v2134_v10  ;;  %2801 = vst [vmem:[#allocation19_spill] sm:$0xff] %v2136_v11  ;;  %v2138_v12 = vld [vmem:[#allocation5 + $0x38] sm:$0xf]  ;;  %v2140_v13 = vld [vmem:[#allocation5 + $0x3c] sm:$0xff] }
  0x1c   :  { %2802 = vst [vmem:[#allocation20_spill] sm:$0xff] %v2138_v12  ;;  %2803 = vst [vmem:[#allocation21_spill] sm:$0xff] %v2140_v13  ;;  %v2142_v14 = vld [vmem:[#allocation5 + $0x44] sm:$0xf]  ;;  %v2144_v15 = vld [vmem:[#allocation5 + $0x48] sm:$0xff] }
  0x1d   :  { %2804 = vst [vmem:[#allocation22_spill] sm:$0xff] %v2142_v14  ;;  %2805 = vst [vmem:[#allocation23_spill] sm:$0xff] %v2144_v15  ;;  %v2146_v16 = vld [vmem:[#allocation5 + $0x50] sm:$0xf]  ;;  %v2148_v17 = vld [vmem:[#allocation5 + $0x54] sm:$0xff] }
  0x1e   :  { %2806 = vst [vmem:[#allocation24_spill] sm:$0xff] %v2146_v16  ;;  %2807 = vst [vmem:[#allocation25_spill] sm:$0xff] %v2148_v17  ;;  %v2150_v18 = vld [vmem:[#allocation5 + $0x5c] sm:$0xf]  ;;  %v2152_v19 = vld [vmem:[#allocation5 + $0x60] sm:$0xff] }
  0x1f   :  { %2808 = vst [vmem:[#allocation26_spill] sm:$0xff] %v2150_v18  ;;  %2809 = vst [vmem:[#allocation27_spill] sm:$0xff] %v2152_v19  ;;  %v2154_v20 = vld [vmem:[#allocation5 + $0x68] sm:$0xf]  ;;  %v2156_v21 = vld [vmem:[#allocation5 + $0x6c] sm:$0xff] }
  0x20   :  { %2810 = vst [vmem:[#allocation28_spill] sm:$0xff] %v2154_v20  ;;  %v2158_v22 = vld [vmem:[#allocation5 + $0x74] sm:$0xf]  ;;  %v2160_v23 = vld [vmem:[#allocation5 + $0x78] sm:$0xff]  ;;  %v2162_v24 = vld [vmem:[#allocation5 + $0x80] sm:$0xf] }
  0x21   :  { %v2164_v25 = vld [vmem:[#allocation5 + $0x84] sm:$0xff]  ;;  %v2166_v26 = vld [vmem:[#allocation5 + $0x8c] sm:$0xf]  ;;  %v2168_v27 = vld [vmem:[#allocation5 + $0x90] sm:$0xff] }
  0x22   :  { %v2170_v28 = vld [vmem:[#allocation5 + $0x98] sm:$0xf]  ;;  %v2172_v29 = vld [vmem:[#allocation5 + $0x9c] sm:$0xff]  ;;  %v2174_v30 = vld [vmem:[#allocation5 + $0xa4] sm:$0xf] }
  0x23   :  { %v2176_v31 = vld [vmem:[#allocation5 + $0xa8] sm:$0xff]  ;;  %v2178_v32 = vld [vmem:[#allocation5 + $0xb0] sm:$0xf]  ;;  %v2180_v33 = vld [vmem:[#allocation5 + $0xb4] sm:$0xff] }
  0x24   :  { %v2182_v34 = vld [vmem:[#allocation5 + $0xbc] sm:$0xf]  ;;  %v2187_v35 = vld [vmem:[%s2773_s3] sm:$0x7]  ;;  %v1890_v39 = vld [vmem:[%s2771_s1 + $0x8] ss:$12 sps:$4 sm:$0xff]  }
  0x25   :  { %v2192_v36 = vld [vmem:[%s2774_s4] sm:$0x1]  ;;  %v1888_v38 = vld [vmem:[%s2771_s1 + $0x4] ss:$12 sps:$4 sm:$0xff]   ;;  %v1892_v41 = vld [vmem:[%s2771_s1 + $0x1c] ss:$12 sps:$4 sm:$0xff]   ;;  %1675 = vmatpush3.bf16.msra.mxu1 %v1890_v39 }
  0x26   :  { %v225_v37 = vld [vmem:[#allocation2] sm:$0x1]   ;;  %100 = vmatprep.subr.bf16.mxu0 %v1888_v38  ;;  %1676 = vmatprep.subr.bf16.mxu1 %v2778_v1  ;;  %v1895_v43 = vld [vmem:[%s2771_s1 + $0x18] ss:$12 sps:$4 sm:$0xff]  }
  0x27   :  { %v1891_v40 = vld [vmem:[%s2771_s1] ss:$12 sps:$4 sm:$0xff]  }
  0x28   :  { %101 = vmatpush1.bf16.msra.mxu0 %v1891_v40  ;;  %v1894_v42 = vld [vmem:[%s2771_s1 + $0x20] ss:$12 sps:$4 sm:$0xff]  }
  0x29   :  { %102 = vmatprep.subr.bf16.mxu0 %v1892_v41  ;;  %v1896_v44 = vld [vmem:[%s2770_s0] sm:$0xff]   ;;  %1677 = vmatpush3.bf16.msra.mxu1 %v1894_v42  ;;  %s2218_s0 = smov 0  }
  0x2c   :  { %103 = vmatpush1.bf16.msra.mxu0 %v1895_v43  ;;  %1679 = vmatmul.mubr.msk.bf16.vlgmr.msra.gmra.mrb[0].mxu1 %vm96_vm1, %v1896_v44 }
  0x2f   :  { %1537 = vmatmul.mubr.msk.bf16.vlgmr.msra.gmra.mrb[0].mxu0 %vm96_vm1, %v1896_v44 }
  0xff   :  { %v177_v45 = vpop.f32.mrb[0].mxu1 }
 0x100   :  { %186 = vst [vmem:[#allocation3 + $0x10] sm:$0xff] %v177_v45  ;;  %v1680_v47 = vpop.f32.mrb[1].mxu1 }
 0x101   :  { %v180_v49 = vpop.f32.mrb[2].mxu1 }
 0x102   :  { %v134_v46 = vpop.f32.mrb[0].mxu0  ;;  %189 = vst [vmem:[#allocation3 + $0x28] sm:$0xff] %v180_v49  ;;  %v1681_v51 = vpop.f32.mrb[3].mxu1 }
 0x103   :  { %184 = vst [vmem:[#allocation3] sm:$0xff] %v134_v46  ;;  %v136_v48 = vpop.f32.mrb[1].mxu0 }
 0x104   :  { %185 = vst [vmem:[#allocation3 + $0x8] sm:$0xff] %v136_v48  ;;  %v138_v50 = vpop.f32.mrb[2].mxu0 }
 0x105   :  { %187 = vst [vmem:[#allocation3 + $0x18] sm:$0xff] %v138_v50  ;;  %v140_v52 = vpop.f32.mrb[3].mxu0 }
 0x106   :  { %188 = vst [vmem:[#allocation3 + $0x20] sm:$0xff] %v140_v52 }
 0x107 LB: > { %v2811_v19 = vld [vmem:[#allocation27_spill] sm:$0xff]  ;;  %v2812_v17 = vld [vmem:[#allocation25_spill] sm:$0xff]  ;;  %v2820_v6 = vld [vmem:[#allocation14_spill] sm:$0xff]  ;;  %v2783_v57 = vmov 0.0   ;;  %v2780_v61 = vmov 0   ;;  %vm2059_vm2 = vmmov 0   ;;  %v2308_v42 = vcombine.high %v2160_v23, %v2164_v25  ;;  %v2045_v37 = vphi %v225_v37, %v2831_v37   ;;  %s2049_s0 = sphi %s2218_s0, %s231_s0  }
 0x108   : > { %v2813_v15 = vld [vmem:[#allocation23_spill] sm:$0xff]  ;;  %v2814_v13 = vld [vmem:[#allocation21_spill] sm:$0xff]  ;;  %v2821_v4 = vld [vmem:[#allocation12_spill] sm:$0xff]  ;;  %1682 = vmatprep.subr.bf16.mxu1 %v2783_v57  ;;  %404 = vmatprep.mubr.bf16.mxu0 %v2780_v61  ;;  %v2292_v39 = vcombine.high %v2811_v19, %v2156_v21  ;;  %v2298_v40 = vcombine.low %v2811_v19, %v2156_v21  ;;  %v2314_v43 = vcombine.low %v2160_v23, %v2164_v25  ;;  %s2397_s1 = sshll.u32 %s2049_s0, 3  ;;  %v462_v52 = vlaneseq  ;;  %s231_s0 = sadd.s32 1, %s2049_s0  }
 0x109   : > { %v2815_v11 = vld [vmem:[#allocation19_spill] sm:$0xff]  ;;  %v2816_v9 = vld [vmem:[#allocation17_spill] sm:$0xff]  ;;  %v2240_v56 = vcombine.low %v2821_v4, %v2820_v6  ;;  %v2822_v10 = vld [vmem:[#allocation18_spill] sm:$0xff]  ;;  %v2274_v0 = vcombine.high %v2813_v15, %v2812_v17  ;;  %1698 = vmatprep.mubr.msk.bf16.mxu1 %vm2059_vm2, %v2783_v57  ;;  %v2282_v2 = vcombine.low %v2813_v15, %v2812_v17  ;;  %v2319_v44 = vcombine.low %v2162_v24, %v2166_v26  ;;  %s234_s8 = sshra.s32 %s2397_s1, 3  ;;  %p489_p8 = scmp.lt.s32.totalorder %s2397_s1, 13 }
 0x10a   : > { %v2817_v7 = vld [vmem:[#allocation15_spill] sm:$0xff]  ;;  %v2818_v5 = vld [vmem:[#allocation13_spill] sm:$0xff]  ;;  %v2823_v8 = vld [vmem:[#allocation16_spill] sm:$0xff]  ;;  %v2257_v60 = vcombine.high %v2815_v11, %v2814_v13  ;;  %v2264_v62 = vcombine.low %v2815_v11, %v2814_v13  ;;  %v2324_v45 = vcombine.high %v2168_v27, %v2172_v29  ;;  %v2330_v46 = vcombine.low %v2168_v27, %v2172_v29  ;;  %s1589_s9 = smul.u32 24, %s234_s8  ;;  %s617_s6 = sadd.s32 1, %s2397_s1 }
 0x10b   : > { %v2819_v3 = vld [vmem:[#allocation11_spill] sm:$0xff]  ;;  %v2236_v55 = vcombine.high %v2817_v7, %v2816_v9  ;;  %v2247_v58 = vcombine.low %v2817_v7, %v2816_v9  ;;  %1683 = vmatpush3.bf16.msra.mxu1 %v2240_v56  ;;  %v2252_v59 = vcombine.low %v2823_v8, %v2822_v10  ;;  %v2824_v14 = vld [vmem:[#allocation22_spill] sm:$0xff]  ;;  %v2825_v12 = vld [vmem:[#allocation20_spill] sm:$0xff]  ;;  %v2335_v47 = vcombine.low %v2170_v28, %v2174_v30  ;;  %s490_s11 = scalar_select %p489_p8, 1, 0 }
 0x10c   : > { %v2228_v53 = vcombine.high %v2819_v3, %v2818_v5  ;;  %v2232_v54 = vcombine.low %v2819_v3, %v2818_v5  ;;  %1684 = vmatprep.subr.bf16.mxu1 %v2783_v57  ;;  %v2269_v63 = vcombine.low %v2825_v12, %v2824_v14  ;;  %v2826_v18 = vld [vmem:[#allocation26_spill] sm:$0xff]  ;;  %v2827_v16 = vld [vmem:[#allocation24_spill] sm:$0xff]  ;;  %v2340_v48 = vcombine.high %v2176_v31, %v2180_v33  ;;  %s2403_s10 = scalar_lea.vmem [#allocation3], %s1589_s9  ;;  %p618_p9 = scmp.lt.s32.totalorder %s617_s6, 13 }
 0x10d   : > { %v2287_v38 = vcombine.low %v2827_v16, %v2826_v18  ;;  %v2828_v20 = vld [vmem:[#allocation28_spill] sm:$0xff]  ;;  %v2346_v49 = vcombine.low %v2176_v31, %v2180_v33  ;;  %v2351_v50 = vcombine.low %v2178_v32, %v2182_v34  ;;  %v243_v51 = vpack.c.bf16 %v2045_v37, %v2045_v37  ;;  %v2409_v3 = vld [vmem:[%s2403_s10 + $0x10] sm:$0xff]  ;;  %v240_v17 = vld [vmem:[%s2403_s10 + $0x8] sm:$0xff]  ;;  %s745_s13 = sadd.s32 2, %s2397_s1  ;;  %s872_s15 = sadd.s32 3, %s2397_s1 }
 0x10e   : > { %372 = vmatprep.subr.bf16.mxu0 %v2228_v53  ;;  %v2303_v41 = vcombine.low %v2828_v20, %v2158_v22  ;;  %s619_s12 = scalar_select %p618_p9, 1, 0 }
 0x10f   : > { %373 = vmatpush1.bf16.msra.mxu0 %v2232_v54  ;;  %1685 = vmatpush3.bf16.msra.mxu1 %v2252_v59  ;;  %p746_p10 = scmp.lt.s32.totalorder %s745_s13, 13  ;;  %p873_p11 = scmp.lt.s32.totalorder %s872_s15, 13 }
 0x110   : > { %374 = vmatprep.subr.bf16.mxu0 %v2236_v55  ;;  %1686 = vmatprep.subr.bf16.mxu1 %v2783_v57  ;;  %s1001_s16 = sadd.s32 4, %s2397_s1  ;;  %s1128_s18 = sadd.s32 5, %s2397_s1 }
 0x111   : > { %s747_s14 = scalar_select %p746_p10, 1, 0 }
 0x112   : > { %s874_s2 = scalar_select %p873_p11, 1, 0 }
 0x113   : > { %375 = vmatpush1.bf16.msra.mxu0 %v2247_v58  ;;  %1687 = vmatpush3.bf16.msra.mxu1 %v2269_v63  ;;  %p1002_p12 = scmp.lt.s32.totalorder %s1001_s16, 13  ;;  %p1129_p13 = scmp.lt.s32.totalorder %s1128_s18, 13 }
 0x114   : > { %376 = vmatprep.subr.bf16.mxu0 %v2257_v60  ;;  %1688 = vmatprep.subr.bf16.mxu1 %v2783_v57  ;;  %s1257_s20 = sadd.s32 6, %s2397_s1  ;;  %s1384_s22 = sadd.s32 7, %s2397_s1 }
 0x115   : > { %s1003_s17 = scalar_select %p1002_p12, 1, 0 }
 0x116   : > { %s1130_s19 = scalar_select %p1129_p13, 1, 0 }
 0x117   : > { %377 = vmatpush1.bf16.msra.mxu0 %v2264_v62  ;;  %1689 = vmatpush3.bf16.msra.mxu1 %v2287_v38  ;;  %p1258_p0 = scmp.lt.s32.totalorder %s1257_s20, 13  ;;  %p1385_p1 = scmp.lt.s32.totalorder %s1384_s22, 13 }
 0x118   : > { %378 = vmatprep.subr.bf16.mxu0 %v2274_v0  ;;  %1690 = vmatprep.subr.bf16.mxu1 %v2783_v57  ;;  %p228_p2 = scmp.ge.s32.totalorder %s231_s0, 2  }
 0x119   : > { %s1259_s21 = scalar_select %p1258_p0, 1, 0 }
 0x11a   : > { %s1386_s23 = scalar_select %p1385_p1, 1, 0 }
 0x11b   : > { %379 = vmatpush1.bf16.msra.mxu0 %v2282_v2  ;;  %1691 = vmatpush3.bf16.msra.mxu1 %v2303_v41  ;;  %v1981_v21 = vld [vmem:[%s2775_s5 + $0x10] sm:$0xff] (%p228_p2)   ;;  %v1982_v22 = vld [vmem:[%s2775_s5 + $0x18] sm:$0xff] (%p228_p2)   ;;  %v1983_v23 = vld [vmem:[%s2775_s5 + $0x20] sm:$0xff] (%p228_p2)   ;;  %vm1503_vm11 = vcmask (%p228_p2), 0  }
 0x11c   : > { %380 = vmatprep.subr.bf16.mxu0 %v2292_v39  ;;  %1692 = vmatprep.subr.bf16.mxu1 %v2783_v57  ;;  %v1984_v24 = vld [vmem:[%s2775_s5 + $0x28] sm:$0xff] (%p228_p2)   ;;  %v1985_v25 = vld [vmem:[%s2775_s5 + $0x30] sm:$0xff] (%p228_p2)   ;;  %v1986_v26 = vld [vmem:[%s2775_s5 + $0x38] sm:$0xff] (%p228_p2)  }
 0x11d   :  { %v1414_v28 = vld [vmem:[#allocation4] sm:$0x1] (%p228_p2) }
 0x11f   : > { %381 = vmatpush1.bf16.msra.mxu0 %v2298_v40  ;;  %1693 = vmatpush3.bf16.msra.mxu1 %v2319_v44 }
 0x120   : > { %382 = vmatprep.subr.bf16.mxu0 %v2308_v42  ;;  %1694 = vmatprep.subr.bf16.mxu1 %v2783_v57 }
 0x123   : > { %383 = vmatpush1.bf16.msra.mxu0 %v2314_v43  ;;  %1695 = vmatpush3.bf16.msra.mxu1 %v2335_v47 }
 0x124   : > { %384 = vmatprep.subr.bf16.mxu0 %v2324_v45  ;;  %1696 = vmatprep.subr.bf16.mxu1 %v2783_v57 }
 0x127   : > { %385 = vmatpush1.bf16.msra.mxu0 %v2330_v46  ;;  %1697 = vmatpush3.bf16.msra.mxu1 %v2351_v50 }
 0x128   : > { %386 = vmatprep.subr.bf16.mxu0 %v2340_v48  ;;  %1702 = vmatprep.subr.bf16.mxu1 %v2783_v57 }
 0x12a   : > { %1699 = vmatmul.mubr.bf16.vlgmr.msra.gmra.mrb[0].mxu1 %v243_v51 }
 0x12b   : > { %387 = vmatpush1.bf16.msra.mxu0 %v2346_v49  ;;  %1703 = vmatpush3.bf16.msra.mxu1 %v2240_v56 }
 0x12c   : > { %495 = vmatprep.subr.bf16.mxu0 %v2228_v53  ;;  %1704 = vmatprep.subr.bf16.mxu1 %v2783_v57 }
 0x12d   : > { %1718 = vmatprep.mubr.msk.bf16.mxu1 %vm2059_vm2, %v2783_v57 }
 0x12e   : > { %405 = vmatmul.mubr.bf16.vlgmr.msra.gmra.mrb[0].mxu0 %v243_v51  ;;  %v2400_v51 = vshrl.u32 %v462_v52, 7 }
 0x12f   : > { %496 = vmatpush1.bf16.msra.mxu0 %v2232_v54  ;;  %527 = vmatprep.mubr.bf16.mxu0 %v2780_v61  ;;  %v2406_v61 = vld [vmem:[%s2403_s10] sm:$0xff] }
 0x130   : > { %497 = vmatprep.subr.bf16.mxu0 %v2236_v55  ;;  %1705 = vmatpush3.bf16.msra.mxu1 %v2252_v59  ;;  %v475_v1 = vsub.s32 2, %v2400_v51 }
 0x131   : > { %1706 = vmatprep.subr.bf16.mxu1 %v2783_v57 }
 0x133   : > { %498 = vmatpush1.bf16.msra.mxu0 %v2247_v58 }
 0x134   : > { %499 = vmatprep.subr.bf16.mxu0 %v2257_v60  ;;  %1707 = vmatpush3.bf16.msra.mxu1 %v2269_v63 }
 0x135   : > { %1708 = vmatprep.subr.bf16.mxu1 %v2783_v57 }
 0x137   : > { %500 = vmatpush1.bf16.msra.mxu0 %v2264_v62 }
 0x138   : > { %501 = vmatprep.subr.bf16.mxu0 %v2274_v0  ;;  %1709 = vmatpush3.bf16.msra.mxu1 %v2287_v38 }
 0x139   : > { %1710 = vmatprep.subr.bf16.mxu1 %v2783_v57 }
 0x13b   : > { %502 = vmatpush1.bf16.msra.mxu0 %v2282_v2 }
 0x13c   : > { %503 = vmatprep.subr.bf16.mxu0 %v2292_v39  ;;  %1711 = vmatpush3.bf16.msra.mxu1 %v2303_v41 }
 0x13d   : > { %1712 = vmatprep.subr.bf16.mxu1 %v2783_v57 }
 0x13f   : > { %504 = vmatpush1.bf16.msra.mxu0 %v2298_v40 }
 0x140   : > { %505 = vmatprep.subr.bf16.mxu0 %v2308_v42  ;;  %1713 = vmatpush3.bf16.msra.mxu1 %v2319_v44 }
 0x141   : > { %1714 = vmatprep.subr.bf16.mxu1 %v2783_v57 }
 0x143   : > { %506 = vmatpush1.bf16.msra.mxu0 %v2314_v43 }
 0x144   : > { %507 = vmatprep.subr.bf16.mxu0 %v2324_v45  ;;  %1715 = vmatpush3.bf16.msra.mxu1 %v2335_v47 }
 0x145   : > { %1716 = vmatprep.subr.bf16.mxu1 %v2783_v57 }
 0x147   : > { %508 = vmatpush1.bf16.msra.mxu0 %v2330_v46 }
 0x148   : > { %509 = vmatprep.subr.bf16.mxu0 %v2340_v48  ;;  %1717 = vmatpush3.bf16.msra.mxu1 %v2351_v50 }
 0x149   : > { %1722 = vmatprep.subr.bf16.mxu1 %v2783_v57  ;;  %v2412_v57 = vrot.slane %v2187_v35, %v475_v1 }
 0x14b   : > { %510 = vmatpush1.bf16.msra.mxu0 %v2346_v49 }
 0x14c   : > { %628 = vmatprep.subr.bf16.mxu0 %v2228_v53 }
 0x1fd   : > { %v447_v5 = vpop.f32.mrb[0].mxu1 }
 0x1fe   : > { %v472_v52 = vadd.f32 %v447_v5, %v2409_v3  ;;  %v1700_v8 = vpop.f32.mrb[1].mxu1  ;;  %v464_v5 = vsub.s32 1, %v2400_v51 }
 0x1ff   : > { %v450_v10 = vpop.f32.mrb[2].mxu1 }
 0x200   : > { %v1701_v13 = vpop.f32.mrb[3].mxu1  ;;  %v478_v14 = vadd.f32 %v2412_v57, %v472_v52  ;;  %v491_v52 = vstv %s490_s11 }
 0x201   : > { %v406_v4 = vpop.f32.mrb[0].mxu0  ;;  %vm492_vm3 = vcmp.eq.s32.totalorder %v491_v52, 1 }
 0x202   : > { %v453_v6 = vadd.f32 %v406_v4, %v2406_v61  ;;  %v408_v7 = vpop.f32.mrb[1].mxu0  ;;  %v1566_v1 = vmul.f32 -1.442695, %v478_v14 }
 0x203   : > { %v410_v9 = vpop.f32.mrb[2].mxu0 }
 0x204   : > { %v454_v11 = vadd.f32 %v453_v6, %v2187_v35  ;;  %v411_v12 = vpop.f32.mrb[3].mxu0  ;;  %v465_v9 = vrot.slane %v2187_v35, %v464_v5 }
 0x205   : > { %v468_v12 = vadd.f32 %v408_v7, %v2192_v36 }
 0x206   : > { %v1565_v15 = vmul.f32 -1.442695, %v454_v11  ;;  %v2421_v6 = vadd.f32 %v465_v9, %v240_v17  ;;  %v2829_v9 = vmov 0.0  }
 0x208   : > { %1897 = vpow2.f32 %v1565_v15 }
 0x209   : > { %1899 = vpow2.f32 %v1566_v1 }
 0x212   : > { %v1898_v16 = vpop.eup %1897 }
 0x213   : > { %v458_v4 = vadd.f32 1.0, %v1898_v16  ;;  %v1900_v8 = vpop.eup %1899 }
 0x214   : > { %v482_v10 = vadd.f32 1.0, %v1900_v8 }
 0x215   : > { %1901 = vrcp.f32 %v458_v4 }
 0x216   : > { %1903 = vrcp.f32 %v482_v10  ;;  %v2830_v10 = vmov 0  }
 0x21f   : > { %v1902_v11 = vpop.eup %1901 }
 0x220   : > { %v469_v13 = vmul.f32 %v1902_v11, %v468_v12  ;;  %v1904_v15 = vpop.eup %1903 }
 0x221   : > { %v485_v16 = vsub.f32 1.0, %v1904_v15  ;;  %v487_v5 = vmul.f32 %v2045_v37, %v1904_v15 }
 0x222   : > { %v470_v14 = vadd.f32 %v469_v13, %v2421_v6 }
 0x224   : > { %1905 = vtanh.f32 %v470_v14 }
 0x22e   : > { %v1906_v1 = vpop.eup %1905 }
 0x22f   : > { %v486_v4 = vmul.f32 %v1906_v1, %v485_v16 }
 0x231   : > { %v488_v17 = vadd.f32 %v487_v5, %v486_v4 }
 0x233   : > { %v2428_v8 = vsel %vm492_vm3, %v488_v17, %v2045_v37  ;;  %v582_v37 = vsub.s32 0, %v2400_v51 }
 0x234   : > { %v494_v7 = vpack.c.bf16 %v2428_v8, %v2428_v8 }
 0x235   : > { %v2469_v14 = vrot.slane %v2187_v35, %v582_v37 }
 0x236   : > { %528 = vmatmul.mubr.bf16.vlgmr.msra.gmra.mrb[4].mxu0 %v494_v7  ;;  %1719 = vmatmul.mubr.bf16.vlgmr.msra.gmra.mrb[4].mxu1 %v494_v7 }
 0x237   : > { %629 = vmatpush1.bf16.msra.mxu0 %v2232_v54  ;;  %1723 = vmatpush3.bf16.msra.mxu1 %v2240_v56 }
 0x238   : > { %630 = vmatprep.subr.bf16.mxu0 %v2236_v55  ;;  %1724 = vmatprep.subr.bf16.mxu1 %v2829_v9 }
 0x239   : > { %660 = vmatprep.mubr.bf16.mxu0 %v2830_v10  ;;  %1738 = vmatprep.mubr.msk.bf16.mxu1 %vm2059_vm2, %v2829_v9 }
 0x23b   : > { %631 = vmatpush1.bf16.msra.mxu0 %v2247_v58  ;;  %1725 = vmatpush3.bf16.msra.mxu1 %v2252_v59 }
 0x23c   : > { %632 = vmatprep.subr.bf16.mxu0 %v2257_v60  ;;  %1726 = vmatprep.subr.bf16.mxu1 %v2829_v9 }
 0x23f   : > { %633 = vmatpush1.bf16.msra.mxu0 %v2264_v62  ;;  %1727 = vmatpush3.bf16.msra.mxu1 %v2269_v63 }
 0x240   : > { %634 = vmatprep.subr.bf16.mxu0 %v2274_v0  ;;  %1728 = vmatprep.subr.bf16.mxu1 %v2829_v9 }
 0x243   : > { %635 = vmatpush1.bf16.msra.mxu0 %v2282_v2  ;;  %1729 = vmatpush3.bf16.msra.mxu1 %v2287_v38 }
 0x244   : > { %636 = vmatprep.subr.bf16.mxu0 %v2292_v39  ;;  %1730 = vmatprep.subr.bf16.mxu1 %v2829_v9 }
 0x247   : > { %637 = vmatpush1.bf16.msra.mxu0 %v2298_v40  ;;  %1731 = vmatpush3.bf16.msra.mxu1 %v2303_v41 }
 0x248   : > { %638 = vmatprep.subr.bf16.mxu0 %v2308_v42  ;;  %1732 = vmatprep.subr.bf16.mxu1 %v2829_v9 }
 0x24b   : > { %639 = vmatpush1.bf16.msra.mxu0 %v2314_v43  ;;  %1733 = vmatpush3.bf16.msra.mxu1 %v2319_v44 }
 0x24c   : > { %640 = vmatprep.subr.bf16.mxu0 %v2324_v45  ;;  %1734 = vmatprep.subr.bf16.mxu1 %v2829_v9 }
 0x24f   : > { %641 = vmatpush1.bf16.msra.mxu0 %v2330_v46  ;;  %1735 = vmatpush3.bf16.msra.mxu1 %v2335_v47 }
 0x250   : > { %642 = vmatprep.subr.bf16.mxu0 %v2340_v48  ;;  %1736 = vmatprep.subr.bf16.mxu1 %v2829_v9 }
 0x253   : > { %643 = vmatpush1.bf16.msra.mxu0 %v2346_v49  ;;  %1737 = vmatpush3.bf16.msra.mxu1 %v2351_v50 }
 0x254   : > { %755 = vmatprep.subr.bf16.mxu0 %v2228_v53  ;;  %1742 = vmatprep.subr.bf16.mxu1 %v2829_v9 }
 0x309   : > { %v529_v12 = vpop.f32.mrb[4].mxu0  ;;  %v570_v11 = vpop.f32.mrb[4].mxu1 }
 0x30a   : > { %v577_v13 = vrot.slane %v529_v12, 7  ;;  %v600_v15 = vrot.slane %v570_v11, 7  ;;  %v531_v16 = vpop.f32.mrb[5].mxu0  ;;  %v1720_v52 = vpop.f32.mrb[5].mxu1 }
 0x30b   : > { %v533_v1 = vpop.f32.mrb[6].mxu0  ;;  %v573_v4 = vpop.f32.mrb[6].mxu1 }
 0x30c   : > { %v579_v5 = vadd.f32 %v577_v13, %v2406_v61  ;;  %v602_v17 = vadd.f32 %v600_v15, %v2409_v3  ;;  %v534_v7 = vpop.f32.mrb[7].mxu0  ;;  %v1721_v18 = vpop.f32.mrb[7].mxu1  ;;  %v592_v13 = vadd.f32 %v531_v16, %v2192_v36 }
 0x30d   : > { %v613_v18 = vrot.slane %v2428_v8, 7 }
 0x30e   : > { %v585_v19 = vadd.f32 %v2469_v14, %v579_v5  ;;  %v603_v51 = vadd.f32 %v602_v17, %v2412_v57  ;;  %v594_v15 = vrot.slane %v592_v13, 7 }
 0x310   : > { %v1567_v20 = vmul.f32 -1.442695, %v585_v19  ;;  %v1568_v12 = vmul.f32 -1.442695, %v603_v51  ;;  %v620_v51 = vstv %s619_s12  ;;  %s2060_s12 = smov (%p228_p2), [#allocation8]  }
 0x311   : > { %vm621_vm4 = vcmp.eq.s32.totalorder %v620_v51, 1  ;;  %s1511_s13 = sshll.u32 (%p228_p2), %s2060_s12, 4  ;;  %s1512_s13 = int_to_ptr.vmem [resolvable:$true] %s1511_s13 }
 0x312   : > { %1907 = vpow2.f32 %v1567_v20  ;;  %s2013_s15 = scalar_lea.vmem (%p228_p2), %s1512_s13, 32  ;;  %p2014_p4 = scmp.lt.s32.totalorder (%p228_p2), %s1512_s13, %s1512_s13 }
 0x313   : > { %1909 = vpow2.f32 %v1568_v12 }
 0x31c   : > { %v1908_v37 = vpop.eup %1907 }
 0x31d   : > { %v1910_v11 = vpop.eup %1909  ;;  %v589_v52 = vadd.f32 1.0, %v1908_v37 }
 0x31e   : > { %v607_v1 = vadd.f32 1.0, %v1910_v11 }
 0x31f   : > { %1911 = vrcp.f32 %v589_v52 }
 0x320   : > { %1913 = vrcp.f32 %v607_v1 }
 0x329   : > { %v1912_v4 = vpop.eup %1911 }
 0x32a   : > { %v1914_v5 = vpop.eup %1913  ;;  %v596_v7 = vmul.f32 %v1912_v4, %v594_v15 }
 0x32b   : > { %v615_v17 = vmul.f32 %v1914_v5, %v613_v18  ;;  %v610_v20 = vsub.f32 1.0, %v1914_v5 }
 0x32c   : > { %v597_v19 = vadd.f32 %v596_v7, %v2421_v6 }
 0x32e   : > { %1915 = vtanh.f32 %v597_v19 }
 0x338   : > { %v1916_v12 = vpop.eup %1915 }
 0x339   : > { %v611_v37 = vmul.f32 %v1916_v12, %v610_v20 }
 0x33b   : > { %v616_v11 = vadd.f32 %v615_v17, %v611_v37 }
 0x33d   : > { %v2479_v16 = vsel %vm621_vm4, %v616_v11, %v613_v18 }
 0x33e   : > { %v623_v8 = vpack.c.bf16 %v2479_v16, %v2479_v16 }
 0x340   : > { %v625_v52 = vshrl.u32 %v623_v8, 16 }
 0x342   : > { %661 = vmatmul.mubr.bf16.vlgmr.msra.gmra.mrb[8].mxu0 %v625_v52  ;;  %1739 = vmatmul.mubr.bf16.vlgmr.msra.gmra.mrb[8].mxu1 %v625_v52 }
 0x343   : > { %756 = vmatpush1.bf16.msra.mxu0 %v2232_v54  ;;  %1743 = vmatpush3.bf16.msra.mxu1 %v2240_v56 }
 0x344   : > { %757 = vmatprep.subr.bf16.mxu0 %v2236_v55  ;;  %1744 = vmatprep.subr.bf16.mxu1 %v2829_v9 }
 0x345   : > { %787 = vmatprep.mubr.bf16.mxu0 %v2830_v10  ;;  %1758 = vmatprep.mubr.msk.bf16.mxu1 %vm2059_vm2, %v2829_v9 }
 0x347   : > { %758 = vmatpush1.bf16.msra.mxu0 %v2247_v58  ;;  %1745 = vmatpush3.bf16.msra.mxu1 %v2252_v59 }
 0x348   : > { %759 = vmatprep.subr.bf16.mxu0 %v2257_v60  ;;  %1746 = vmatprep.subr.bf16.mxu1 %v2829_v9 }
 0x34b   : > { %760 = vmatpush1.bf16.msra.mxu0 %v2264_v62  ;;  %1747 = vmatpush3.bf16.msra.mxu1 %v2269_v63 }
 0x34c   : > { %761 = vmatprep.subr.bf16.mxu0 %v2274_v0  ;;  %1748 = vmatprep.subr.bf16.mxu1 %v2829_v9 }
 0x34f   : > { %762 = vmatpush1.bf16.msra.mxu0 %v2282_v2  ;;  %1749 = vmatpush3.bf16.msra.mxu1 %v2287_v38 }
 0x350   : > { %763 = vmatprep.subr.bf16.mxu0 %v2292_v39  ;;  %1750 = vmatprep.subr.bf16.mxu1 %v2829_v9 }
 0x353   : > { %764 = vmatpush1.bf16.msra.mxu0 %v2298_v40  ;;  %1751 = vmatpush3.bf16.msra.mxu1 %v2303_v41 }
 0x354   : > { %765 = vmatprep.subr.bf16.mxu0 %v2308_v42  ;;  %1752 = vmatprep.subr.bf16.mxu1 %v2829_v9 }
 0x357   : > { %766 = vmatpush1.bf16.msra.mxu0 %v2314_v43  ;;  %1753 = vmatpush3.bf16.msra.mxu1 %v2319_v44 }
 0x358   : > { %767 = vmatprep.subr.bf16.mxu0 %v2324_v45  ;;  %1754 = vmatprep.subr.bf16.mxu1 %v2829_v9 }
 0x35b   : > { %768 = vmatpush1.bf16.msra.mxu0 %v2330_v46  ;;  %1755 = vmatpush3.bf16.msra.mxu1 %v2335_v47 }
 0x35c   : > { %769 = vmatprep.subr.bf16.mxu0 %v2340_v48  ;;  %1756 = vmatprep.subr.bf16.mxu1 %v2829_v9 }
 0x35f   : > { %770 = vmatpush1.bf16.msra.mxu0 %v2346_v49  ;;  %1757 = vmatpush3.bf16.msra.mxu1 %v2351_v50 }
 0x360   : > { %884 = vmatprep.subr.bf16.mxu0 %v2228_v53  ;;  %1762 = vmatprep.subr.bf16.mxu1 %v2829_v9 }
 0x415   : > { %v662_v1 = vpop.f32.mrb[8].mxu0  ;;  %v703_v13 = vpop.f32.mrb[8].mxu1 }
 0x416   : > { %v710_v15 = vrot.slane %v662_v1, 6  ;;  %v728_v4 = vrot.slane %v703_v13, 6  ;;  %v664_v18 = vpop.f32.mrb[9].mxu0  ;;  %v1740_v5 = vpop.f32.mrb[9].mxu1 }
 0x417   : > { %v666_v7 = vpop.f32.mrb[10].mxu0  ;;  %v706_v17 = vpop.f32.mrb[10].mxu1 }
 0x418   : > { %v712_v19 = vadd.f32 %v710_v15, %v2406_v61  ;;  %v730_v20 = vadd.f32 %v728_v4, %v2409_v3  ;;  %v667_v51 = vpop.f32.mrb[11].mxu0  ;;  %v1741_v12 = vpop.f32.mrb[11].mxu1  ;;  %v720_v15 = vadd.f32 %v664_v18, %v2192_v36 }
 0x419   : > { %v741_v51 = vrot.slane %v2479_v16, 7 }
 0x41a   : > { %v713_v37 = vadd.f32 %v712_v19, %v2469_v14  ;;  %v731_v11 = vadd.f32 %v730_v20, %v2412_v57  ;;  %v722_v4 = vrot.slane %v720_v15, 6 }
 0x41c   : > { %v1569_v8 = vmul.f32 -1.442695, %v713_v37  ;;  %v1570_v52 = vmul.f32 -1.442695, %v731_v11 }
 0x41e   : > { %1917 = vpow2.f32 %v1569_v8  ;;  %v748_v8 = vstv %s747_s14  ;;  %s2009_s14 = scalar_lea.vmem (%p228_p2), %s1512_s13, 16 }
 0x41f   : > { %1919 = vpow2.f32 %v1570_v52  ;;  %vm749_vm5 = vcmp.eq.s32.totalorder %v748_v8, 1  ;;  %p2010_p3 = scmp.ne.s32.totalorder (%p228_p2), %s1512_s13, %s2009_s14  ;;  %p2015_p5 = scmp.lt.s32.totalorder (%p228_p2), %s2013_s15, %s2009_s14 }
 0x421   :  { %p2016_p6 = por (%p228_p2), %p2015_p5, %p2014_p4 }
 0x423   :  { %p2017_p7 = pnand (%p228_p2), %p2016_p6, %p2010_p3 }
 0x428   : > { %v1918_v1 = vpop.eup %1917 }
 0x429   : > { %v1920_v13 = vpop.eup %1919  ;;  %v717_v5 = vadd.f32 1.0, %v1918_v1 }
 0x42a   : > { %v735_v7 = vadd.f32 1.0, %v1920_v13 }
 0x42b   : > { %1921 = vrcp.f32 %v717_v5 }
 0x42c   : > { %1923 = vrcp.f32 %v735_v7 }
 0x435   : > { %v1922_v17 = vpop.eup %1921 }
 0x436   : > { %v1924_v19 = vpop.eup %1923  ;;  %v724_v12 = vmul.f32 %v1922_v17, %v722_v4 }
 0x437   : > { %v743_v20 = vmul.f32 %v1924_v19, %v741_v51  ;;  %v738_v11 = vsub.f32 1.0, %v1924_v19 }
 0x438   : > { %v725_v37 = vadd.f32 %v724_v12, %v2421_v6 }
 0x43a   : > { %1925 = vtanh.f32 %v725_v37 }
 0x444   : > { %v1926_v52 = vpop.eup %1925 }
 0x445   : > { %v739_v1 = vmul.f32 %v1926_v52, %v738_v11 }
 0x447   : > { %v744_v13 = vadd.f32 %v743_v20, %v739_v1 }
 0x449   : > { %v2526_v18 = vsel %vm749_vm5, %v744_v13, %v741_v51 }
 0x44a   : > { %v751_v16 = vpack.c.bf16 %v2526_v18, %v2526_v18 }
 0x44c   : > { %v753_v5 = vrot.slane %v751_v16, 1 }
 0x44e   : > { %788 = vmatmul.mubr.bf16.vlgmr.msra.gmra.mrb[12].mxu0 %v753_v5  ;;  %1759 = vmatmul.mubr.bf16.vlgmr.msra.gmra.mrb[12].mxu1 %v753_v5 }
 0x44f   : > { %885 = vmatpush1.bf16.msra.mxu0 %v2232_v54  ;;  %1763 = vmatpush3.bf16.msra.mxu1 %v2240_v56 }
 0x450   : > { %886 = vmatprep.subr.bf16.mxu0 %v2236_v55  ;;  %1764 = vmatprep.subr.bf16.mxu1 %v2829_v9 }
 0x451   : > { %916 = vmatprep.mubr.bf16.mxu0 %v2830_v10  ;;  %1778 = vmatprep.mubr.msk.bf16.mxu1 %vm2059_vm2, %v2829_v9 }
 0x453   : > { %887 = vmatpush1.bf16.msra.mxu0 %v2247_v58  ;;  %1765 = vmatpush3.bf16.msra.mxu1 %v2252_v59 }
 0x454   : > { %888 = vmatprep.subr.bf16.mxu0 %v2257_v60  ;;  %1766 = vmatprep.subr.bf16.mxu1 %v2829_v9 }
 0x457   : > { %889 = vmatpush1.bf16.msra.mxu0 %v2264_v62  ;;  %1767 = vmatpush3.bf16.msra.mxu1 %v2269_v63 }
 0x458   : > { %890 = vmatprep.subr.bf16.mxu0 %v2274_v0  ;;  %1768 = vmatprep.subr.bf16.mxu1 %v2829_v9 }
 0x45b   : > { %891 = vmatpush1.bf16.msra.mxu0 %v2282_v2  ;;  %1769 = vmatpush3.bf16.msra.mxu1 %v2287_v38 }
 0x45c   : > { %892 = vmatprep.subr.bf16.mxu0 %v2292_v39  ;;  %1770 = vmatprep.subr.bf16.mxu1 %v2829_v9 }
 0x45f   : > { %893 = vmatpush1.bf16.msra.mxu0 %v2298_v40  ;;  %1771 = vmatpush3.bf16.msra.mxu1 %v2303_v41 }
 0x460   : > { %894 = vmatprep.subr.bf16.mxu0 %v2308_v42  ;;  %1772 = vmatprep.subr.bf16.mxu1 %v2829_v9 }
 0x463   : > { %895 = vmatpush1.bf16.msra.mxu0 %v2314_v43  ;;  %1773 = vmatpush3.bf16.msra.mxu1 %v2319_v44 }
 0x464   : > { %896 = vmatprep.subr.bf16.mxu0 %v2324_v45  ;;  %1774 = vmatprep.subr.bf16.mxu1 %v2829_v9 }
 0x467   : > { %897 = vmatpush1.bf16.msra.mxu0 %v2330_v46  ;;  %1775 = vmatpush3.bf16.msra.mxu1 %v2335_v47 }
 0x468   : > { %898 = vmatprep.subr.bf16.mxu0 %v2340_v48  ;;  %1776 = vmatprep.subr.bf16.mxu1 %v2829_v9 }
 0x46b   : > { %899 = vmatpush1.bf16.msra.mxu0 %v2346_v49  ;;  %1777 = vmatpush3.bf16.msra.mxu1 %v2351_v50 }
 0x46c   : > { %1011 = vmatprep.subr.bf16.mxu0 %v2228_v53  ;;  %1782 = vmatprep.subr.bf16.mxu1 %v2829_v9 }
 0x521   : > { %v789_v7 = vpop.f32.mrb[12].mxu0  ;;  %v830_v15 = vpop.f32.mrb[12].mxu1 }
 0x522   : > { %v837_v4 = vrot.slane %v789_v7, 5  ;;  %v855_v17 = vrot.slane %v830_v15, 5  ;;  %v791_v51 = vpop.f32.mrb[13].mxu0  ;;  %v1760_v19 = vpop.f32.mrb[13].mxu1 }
 0x523   : > { %v793_v12 = vpop.f32.mrb[14].mxu0  ;;  %v833_v20 = vpop.f32.mrb[14].mxu1 }
 0x524   : > { %v839_v37 = vadd.f32 %v837_v4, %v2406_v61  ;;  %v857_v11 = vadd.f32 %v855_v17, %v2409_v3  ;;  %v794_v8 = vpop.f32.mrb[15].mxu0  ;;  %v1761_v52 = vpop.f32.mrb[15].mxu1  ;;  %v847_v4 = vadd.f32 %v791_v51, %v2192_v36 }
 0x525   : > { %v868_v8 = vrot.slane %v2526_v18, 7 }
 0x526   : > { %v840_v1 = vadd.f32 %v839_v37, %v2469_v14  ;;  %v858_v13 = vadd.f32 %v857_v11, %v2412_v57  ;;  %v849_v17 = vrot.slane %v847_v4, 5 }
 0x528   : > { %v1571_v16 = vmul.f32 -1.442695, %v840_v1  ;;  %v1572_v5 = vmul.f32 -1.442695, %v858_v13 }
 0x52a   : > { %1927 = vpow2.f32 %v1571_v16  ;;  %v875_v16 = vstv %s874_s2 }
 0x52b   : > { %1929 = vpow2.f32 %v1572_v5  ;;  %vm876_vm6 = vcmp.eq.s32.totalorder %v875_v16, 1 }
 0x534   : > { %v1928_v7 = vpop.eup %1927 }
 0x535   : > { %v1930_v15 = vpop.eup %1929  ;;  %v844_v19 = vadd.f32 1.0, %v1928_v7 }
 0x536   : > { %v862_v12 = vadd.f32 1.0, %v1930_v15 }
 0x537   : > { %1931 = vrcp.f32 %v844_v19 }
 0x538   : > { %1933 = vrcp.f32 %v862_v12 }
 0x541   : > { %v1932_v20 = vpop.eup %1931 }
 0x542   : > { %v1934_v37 = vpop.eup %1933  ;;  %v851_v52 = vmul.f32 %v1932_v20, %v849_v17 }
 0x543   : > { %v870_v11 = vmul.f32 %v1934_v37, %v868_v8  ;;  %v865_v13 = vsub.f32 1.0, %v1934_v37 }
 0x544   : > { %v852_v1 = vadd.f32 %v851_v52, %v2421_v6 }
 0x546   : > { %1935 = vtanh.f32 %v852_v1 }
 0x550   : > { %v1936_v5 = vpop.eup %1935 }
 0x551   : > { %v866_v7 = vmul.f32 %v1936_v5, %v865_v13 }
 0x553   : > { %v871_v15 = vadd.f32 %v870_v11, %v866_v7 }
 0x555   : > { %v2573_v51 = vsel %vm876_vm6, %v871_v15, %v868_v8 }
 0x556   : > { %v878_v18 = vpack.c.bf16 %v2573_v51, %v2573_v51 }
 0x558   : > { %v880_v19 = vshrl.u32 %v878_v18, 16 }
 0x55a   : > { %v882_v12 = vrot.slane %v880_v19, 1 }
 0x55c   : > { %917 = vmatmul.mubr.bf16.vlgmr.msra.gmra.mrb[16].mxu0 %v882_v12  ;;  %1779 = vmatmul.mubr.bf16.vlgmr.msra.gmra.mrb[16].mxu1 %v882_v12 }
 0x55d   : > { %1012 = vmatpush1.bf16.msra.mxu0 %v2232_v54  ;;  %1783 = vmatpush3.bf16.msra.mxu1 %v2240_v56 }
 0x55e   : > { %1013 = vmatprep.subr.bf16.mxu0 %v2236_v55  ;;  %1784 = vmatprep.subr.bf16.mxu1 %v2829_v9 }
 0x55f   : > { %1043 = vmatprep.mubr.bf16.mxu0 %v2830_v10  ;;  %1798 = vmatprep.mubr.msk.bf16.mxu1 %vm2059_vm2, %v2829_v9 }
 0x561   : > { %1014 = vmatpush1.bf16.msra.mxu0 %v2247_v58  ;;  %1785 = vmatpush3.bf16.msra.mxu1 %v2252_v59 }
 0x562   : > { %1015 = vmatprep.subr.bf16.mxu0 %v2257_v60  ;;  %1786 = vmatprep.subr.bf16.mxu1 %v2829_v9 }
 0x565   : > { %1016 = vmatpush1.bf16.msra.mxu0 %v2264_v62  ;;  %1787 = vmatpush3.bf16.msra.mxu1 %v2269_v63 }
 0x566   : > { %1017 = vmatprep.subr.bf16.mxu0 %v2274_v0  ;;  %1788 = vmatprep.subr.bf16.mxu1 %v2829_v9 }
 0x569   : > { %1018 = vmatpush1.bf16.msra.mxu0 %v2282_v2  ;;  %1789 = vmatpush3.bf16.msra.mxu1 %v2287_v38 }
 0x56a   : > { %1019 = vmatprep.subr.bf16.mxu0 %v2292_v39  ;;  %1790 = vmatprep.subr.bf16.mxu1 %v2829_v9 }
 0x56d   : > { %1020 = vmatpush1.bf16.msra.mxu0 %v2298_v40  ;;  %1791 = vmatpush3.bf16.msra.mxu1 %v2303_v41 }
 0x56e   : > { %1021 = vmatprep.subr.bf16.mxu0 %v2308_v42  ;;  %1792 = vmatprep.subr.bf16.mxu1 %v2829_v9 }
 0x571   : > { %1022 = vmatpush1.bf16.msra.mxu0 %v2314_v43  ;;  %1793 = vmatpush3.bf16.msra.mxu1 %v2319_v44 }
 0x572   : > { %1023 = vmatprep.subr.bf16.mxu0 %v2324_v45  ;;  %1794 = vmatprep.subr.bf16.mxu1 %v2829_v9 }
 0x575   : > { %1024 = vmatpush1.bf16.msra.mxu0 %v2330_v46  ;;  %1795 = vmatpush3.bf16.msra.mxu1 %v2335_v47 }
 0x576   : > { %1025 = vmatprep.subr.bf16.mxu0 %v2340_v48  ;;  %1796 = vmatprep.subr.bf16.mxu1 %v2829_v9 }
 0x579   : > { %1026 = vmatpush1.bf16.msra.mxu0 %v2346_v49  ;;  %1797 = vmatpush3.bf16.msra.mxu1 %v2351_v50 }
 0x57a   : > { %1140 = vmatprep.subr.bf16.mxu0 %v2228_v53  ;;  %1802 = vmatprep.subr.bf16.mxu1 %v2829_v9 }
 0x62f   : > { %v918_v4 = vpop.f32.mrb[16].mxu0  ;;  %v959_v17 = vpop.f32.mrb[16].mxu1 }
 0x630   : > { %v966_v20 = vrot.slane %v918_v4, 4  ;;  %v984_v8 = vrot.slane %v959_v17, 4  ;;  %v920_v37 = vpop.f32.mrb[17].mxu0  ;;  %v1780_v52 = vpop.f32.mrb[17].mxu1 }
 0x631   : > { %v922_v11 = vpop.f32.mrb[18].mxu0  ;;  %v962_v1 = vpop.f32.mrb[18].mxu1 }
 0x632   : > { %v968_v13 = vadd.f32 %v966_v20, %v2406_v61  ;;  %v986_v16 = vadd.f32 %v984_v8, %v2409_v3  ;;  %v923_v5 = vpop.f32.mrb[19].mxu0  ;;  %v1781_v7 = vpop.f32.mrb[19].mxu1  ;;  %v976_v20 = vadd.f32 %v920_v37, %v2192_v36 }
 0x633   : > { %v997_v5 = vrot.slane %v2573_v51, 7 }
 0x634   : > { %v969_v15 = vadd.f32 %v968_v13, %v2469_v14  ;;  %v987_v18 = vadd.f32 %v986_v16, %v2412_v57  ;;  %v978_v8 = vrot.slane %v976_v20, 4 }
 0x636   : > { %v1573_v19 = vmul.f32 -1.442695, %v969_v15  ;;  %v1574_v12 = vmul.f32 -1.442695, %v987_v18 }
 0x638   : > { %1937 = vpow2.f32 %v1573_v19  ;;  %v1004_v19 = vstv %s1003_s17 }
 0x639   : > { %1939 = vpow2.f32 %v1574_v12  ;;  %vm1005_vm7 = vcmp.eq.s32.totalorder %v1004_v19, 1 }
 0x642   : > { %v1938_v4 = vpop.eup %1937 }
 0x643   : > { %v1940_v17 = vpop.eup %1939  ;;  %v973_v52 = vadd.f32 1.0, %v1938_v4 }
 0x644   : > { %v991_v11 = vadd.f32 1.0, %v1940_v17 }
 0x645   : > { %1941 = vrcp.f32 %v973_v52 }
 0x646   : > { %1943 = vrcp.f32 %v991_v11 }
 0x64f   : > { %v1942_v1 = vpop.eup %1941 }
 0x650   : > { %v1944_v13 = vpop.eup %1943  ;;  %v980_v7 = vmul.f32 %v1942_v1, %v978_v8 }
 0x651   : > { %v999_v16 = vmul.f32 %v1944_v13, %v997_v5  ;;  %v994_v18 = vsub.f32 1.0, %v1944_v13 }
 0x652   : > { %v981_v15 = vadd.f32 %v980_v7, %v2421_v6 }
 0x654   : > { %1945 = vtanh.f32 %v981_v15 }
 0x65e   : > { %v1946_v12 = vpop.eup %1945 }
 0x65f   : > { %v995_v4 = vmul.f32 %v1946_v12, %v994_v18 }
 0x661   : > { %v1000_v17 = vadd.f32 %v999_v16, %v995_v4 }
 0x663   : > { %v2620_v37 = vsel %vm1005_vm7, %v1000_v17, %v997_v5 }
 0x664   : > { %v1007_v51 = vpack.c.bf16 %v2620_v37, %v2620_v37 }
 0x666   : > { %v1009_v52 = vrot.slane %v1007_v51, 2 }
 0x668   : > { %1044 = vmatmul.mubr.bf16.vlgmr.msra.gmra.mrb[20].mxu0 %v1009_v52  ;;  %1799 = vmatmul.mubr.bf16.vlgmr.msra.gmra.mrb[20].mxu1 %v1009_v52 }
 0x669   : > { %1141 = vmatpush1.bf16.msra.mxu0 %v2232_v54  ;;  %1803 = vmatpush3.bf16.msra.mxu1 %v2240_v56 }
 0x66a   : > { %1142 = vmatprep.subr.bf16.mxu0 %v2236_v55  ;;  %1804 = vmatprep.subr.bf16.mxu1 %v2829_v9 }
 0x66b   : > { %1172 = vmatprep.mubr.bf16.mxu0 %v2830_v10  ;;  %1818 = vmatprep.mubr.msk.bf16.mxu1 %vm2059_vm2, %v2829_v9 }
 0x66d   : > { %1143 = vmatpush1.bf16.msra.mxu0 %v2247_v58  ;;  %1805 = vmatpush3.bf16.msra.mxu1 %v2252_v59 }
 0x66e   : > { %1144 = vmatprep.subr.bf16.mxu0 %v2257_v60  ;;  %1806 = vmatprep.subr.bf16.mxu1 %v2829_v9 }
 0x671   : > { %1145 = vmatpush1.bf16.msra.mxu0 %v2264_v62  ;;  %1807 = vmatpush3.bf16.msra.mxu1 %v2269_v63 }
 0x672   : > { %1146 = vmatprep.subr.bf16.mxu0 %v2274_v0  ;;  %1808 = vmatprep.subr.bf16.mxu1 %v2829_v9 }
 0x675   : > { %1147 = vmatpush1.bf16.msra.mxu0 %v2282_v2  ;;  %1809 = vmatpush3.bf16.msra.mxu1 %v2287_v38 }
 0x676   : > { %1148 = vmatprep.subr.bf16.mxu0 %v2292_v39  ;;  %1810 = vmatprep.subr.bf16.mxu1 %v2829_v9 }
 0x679   : > { %1149 = vmatpush1.bf16.msra.mxu0 %v2298_v40  ;;  %1811 = vmatpush3.bf16.msra.mxu1 %v2303_v41 }
 0x67a   : > { %1150 = vmatprep.subr.bf16.mxu0 %v2308_v42  ;;  %1812 = vmatprep.subr.bf16.mxu1 %v2829_v9 }
 0x67d   : > { %1151 = vmatpush1.bf16.msra.mxu0 %v2314_v43  ;;  %1813 = vmatpush3.bf16.msra.mxu1 %v2319_v44 }
 0x67e   : > { %1152 = vmatprep.subr.bf16.mxu0 %v2324_v45  ;;  %1814 = vmatprep.subr.bf16.mxu1 %v2829_v9 }
 0x681   : > { %1153 = vmatpush1.bf16.msra.mxu0 %v2330_v46  ;;  %1815 = vmatpush3.bf16.msra.mxu1 %v2335_v47 }
 0x682   : > { %1154 = vmatprep.subr.bf16.mxu0 %v2340_v48  ;;  %1816 = vmatprep.subr.bf16.mxu1 %v2829_v9 }
 0x685   : > { %1155 = vmatpush1.bf16.msra.mxu0 %v2346_v49  ;;  %1817 = vmatpush3.bf16.msra.mxu1 %v2351_v50 }
 0x686   : > { %1267 = vmatprep.subr.bf16.mxu0 %v2228_v53  ;;  %1822 = vmatprep.subr.bf16.mxu1 %v2829_v9 }
 0x73b   : > { %v1045_v11 = vpop.f32.mrb[20].mxu0  ;;  %v1086_v20 = vpop.f32.mrb[20].mxu1 }
 0x73c   : > { %v1093_v8 = vrot.slane %v1045_v11, 3  ;;  %v1111_v1 = vrot.slane %v1086_v20, 3  ;;  %v1047_v5 = vpop.f32.mrb[21].mxu0  ;;  %v1800_v13 = vpop.f32.mrb[21].mxu1 }
 0x73d   : > { %v1049_v7 = vpop.f32.mrb[22].mxu0  ;;  %v1089_v16 = vpop.f32.mrb[22].mxu1 }
 0x73e   : > { %v1095_v15 = vadd.f32 %v1093_v8, %v2406_v61  ;;  %v1113_v18 = vadd.f32 %v1111_v1, %v2409_v3  ;;  %v1050_v19 = vpop.f32.mrb[23].mxu0  ;;  %v1801_v12 = vpop.f32.mrb[23].mxu1  ;;  %v1103_v8 = vadd.f32 %v1047_v5, %v2192_v36  ;;  %v1124_v16 = vrot.slane %v2620_v37, 7 }
 0x740   : > { %v1096_v4 = vadd.f32 %v1095_v15, %v2469_v14  ;;  %v1114_v53 = vadd.f32 %v1113_v18, %v2412_v57  ;;  %v1105_v1 = vrot.slane %v1103_v8, 3 }
 0x742   : > { %v1575_v17 = vmul.f32 -1.442695, %v1096_v4  ;;  %v1576_v51 = vmul.f32 -1.442695, %v1114_v53  ;;  %v1131_v53 = vstv %s1130_s19 }
 0x743   : > { %vm1132_vm8 = vcmp.eq.s32.totalorder %v1131_v53, 1 }
 0x744   : > { %1947 = vpow2.f32 %v1575_v17 }
 0x745   : > { %1949 = vpow2.f32 %v1576_v51 }
 0x74e   : > { %v1948_v52 = vpop.eup %1947 }
 0x74f   : > { %v1950_v11 = vpop.eup %1949  ;;  %v1100_v20 = vadd.f32 1.0, %v1948_v52 }
 0x750   : > { %v1118_v13 = vadd.f32 1.0, %v1950_v11 }
 0x751   : > { %1951 = vrcp.f32 %v1100_v20 }
 0x752   : > { %1953 = vrcp.f32 %v1118_v13 }
 0x75b   : > { %v1952_v7 = vpop.eup %1951 }
 0x75c   : > { %v1954_v15 = vpop.eup %1953  ;;  %v1107_v19 = vmul.f32 %v1952_v7, %v1105_v1  ;;  %v1260_v1 = vstv %s1259_s21 }
 0x75d   : > { %v1126_v18 = vmul.f32 %v1954_v15, %v1124_v16  ;;  %v1121_v4 = vsub.f32 1.0, %v1954_v15  ;;  %vm1261_vm9 = vcmp.eq.s32.totalorder %v1260_v1, 1 }
 0x75e   : > { %v1108_v12 = vadd.f32 %v1107_v19, %v2421_v6 }
 0x760   : > { %1955 = vtanh.f32 %v1108_v12 }
 0x76a   : > { %v1956_v17 = vpop.eup %1955 }
 0x76b   : > { %v1122_v51 = vmul.f32 %v1956_v17, %v1121_v4 }
 0x76d   : > { %v1127_v52 = vadd.f32 %v1126_v18, %v1122_v51 }
 0x76f   : > { %v2667_v5 = vsel %vm1132_vm8, %v1127_v52, %v1124_v16 }
 0x770   : > { %v1134_v37 = vpack.c.bf16 %v2667_v5, %v2667_v5 }
 0x772   : > { %v1136_v11 = vshrl.u32 %v1134_v37, 16 }
 0x774   : > { %v1138_v20 = vrot.slane %v1136_v11, 2 }
 0x776   : > { %1173 = vmatmul.mubr.bf16.vlgmr.msra.gmra.mrb[24].mxu0 %v1138_v20  ;;  %1819 = vmatmul.mubr.bf16.vlgmr.msra.gmra.mrb[24].mxu1 %v1138_v20  ;;  %v1977_v20 = vld [vmem:[%s2403_s10] sm:$0xff] }
 0x777   : > { %1268 = vmatpush1.bf16.msra.mxu0 %v2232_v54  ;;  %1823 = vmatpush3.bf16.msra.mxu1 %v2240_v56 }
 0x778   : > { %1269 = vmatprep.subr.bf16.mxu0 %v2236_v55  ;;  %1824 = vmatprep.subr.bf16.mxu1 %v2829_v9 }
 0x779   : > { %1299 = vmatprep.mubr.bf16.mxu0 %v2830_v10  ;;  %1838 = vmatprep.mubr.msk.bf16.mxu1 %vm2059_vm2, %v2829_v9 }
 0x77b   : > { %1270 = vmatpush1.bf16.msra.mxu0 %v2247_v58  ;;  %1825 = vmatpush3.bf16.msra.mxu1 %v2252_v59 }
 0x77c   : > { %1271 = vmatprep.subr.bf16.mxu0 %v2257_v60  ;;  %1826 = vmatprep.subr.bf16.mxu1 %v2829_v9 }
 0x77f   : > { %1272 = vmatpush1.bf16.msra.mxu0 %v2264_v62  ;;  %1827 = vmatpush3.bf16.msra.mxu1 %v2269_v63 }
 0x780   : > { %1273 = vmatprep.subr.bf16.mxu0 %v2274_v0  ;;  %1828 = vmatprep.subr.bf16.mxu1 %v2829_v9 }
 0x783   : > { %1274 = vmatpush1.bf16.msra.mxu0 %v2282_v2  ;;  %1829 = vmatpush3.bf16.msra.mxu1 %v2287_v38 }
 0x784   : > { %1275 = vmatprep.subr.bf16.mxu0 %v2292_v39  ;;  %1830 = vmatprep.subr.bf16.mxu1 %v2829_v9 }
 0x787   : > { %1276 = vmatpush1.bf16.msra.mxu0 %v2298_v40  ;;  %1831 = vmatpush3.bf16.msra.mxu1 %v2303_v41 }
 0x788   : > { %1277 = vmatprep.subr.bf16.mxu0 %v2308_v42  ;;  %1832 = vmatprep.subr.bf16.mxu1 %v2829_v9 }
 0x78b   : > { %1278 = vmatpush1.bf16.msra.mxu0 %v2314_v43  ;;  %1833 = vmatpush3.bf16.msra.mxu1 %v2319_v44 }
 0x78c   : > { %1279 = vmatprep.subr.bf16.mxu0 %v2324_v45  ;;  %1834 = vmatprep.subr.bf16.mxu1 %v2829_v9 }
 0x78f   : > { %1280 = vmatpush1.bf16.msra.mxu0 %v2330_v46  ;;  %1835 = vmatpush3.bf16.msra.mxu1 %v2335_v47 }
 0x790   : > { %1281 = vmatprep.subr.bf16.mxu0 %v2340_v48  ;;  %1836 = vmatprep.subr.bf16.mxu1 %v2829_v9 }
 0x793   : > { %1282 = vmatpush1.bf16.msra.mxu0 %v2346_v49  ;;  %1837 = vmatpush3.bf16.msra.mxu1 %v2351_v50  ;;  %v1253_v49 = vrot.slane %v2667_v5, 7 }
 0x849   : > { %v1174_v54 = vpop.f32.mrb[24].mxu0  ;;  %v1215_v55 = vpop.f32.mrb[24].mxu1 }
 0x84a   : > { %v1222_v56 = vrot.slane %v1174_v54, 2  ;;  %v1240_v58 = vrot.slane %v1215_v55, 2  ;;  %v1176_v59 = vpop.f32.mrb[25].mxu0  ;;  %v1820_v60 = vpop.f32.mrb[25].mxu1  ;;  %v1978_v55 = vld [vmem:[%s2403_s10 + $0x10] sm:$0xff] }
 0x84b   : > { %v1178_v62 = vpop.f32.mrb[26].mxu0  ;;  %v1218_v63 = vpop.f32.mrb[26].mxu1 }
 0x84c   : > { %v1224_v0 = vadd.f32 %v1222_v56, %v2406_v61  ;;  %v1242_v2 = vadd.f32 %v1240_v58, %v2409_v3  ;;  %v1179_v38 = vpop.f32.mrb[27].mxu0  ;;  %v1821_v39 = vpop.f32.mrb[27].mxu1  ;;  %v1232_v61 = vadd.f32 %v1176_v59, %v2192_v36 }
 0x84e   : > { %v1225_v40 = vadd.f32 %v1224_v0, %v2469_v14  ;;  %v1243_v41 = vadd.f32 %v1242_v2, %v2412_v57  ;;  %v1234_v3 = vrot.slane %v1232_v61, 2  ;;  %v1387_v61 = vstv %s1386_s23 }
 0x84f   : > { %vm1388_vm10 = vcmp.eq.s32.totalorder %v1387_v61, 1 }
 0x850   : > { %v1577_v42 = vmul.f32 -1.442695, %v1225_v40  ;;  %v1578_v43 = vmul.f32 -1.442695, %v1243_v41 }
 0x852   : > { %1957 = vpow2.f32 %v1577_v42 }
 0x853   : > { %1959 = vpow2.f32 %v1578_v43 }
 0x85c   : > { %v1958_v44 = vpop.eup %1957 }
 0x85d   : > { %v1960_v45 = vpop.eup %1959  ;;  %v1229_v46 = vadd.f32 1.0, %v1958_v44 }
 0x85e   : > { %v1247_v47 = vadd.f32 1.0, %v1960_v45 }
 0x85f   : > { %1961 = vrcp.f32 %v1229_v46 }
 0x860   : > { %1963 = vrcp.f32 %v1247_v47 }
 0x869   : > { %v1962_v48 = vpop.eup %1961 }
 0x86a   : > { %v1964_v50 = vpop.eup %1963  ;;  %v1236_v9 = vmul.f32 %v1962_v48, %v1234_v3 }
 0x86b   : > { %v1255_v10 = vmul.f32 %v1964_v50, %v1253_v49  ;;  %v1250_v8 = vsub.f32 1.0, %v1964_v50 }
 0x86c   : > { %v1237_v13 = vadd.f32 %v1236_v9, %v2421_v6 }
 0x86e   : > { %1965 = vtanh.f32 %v1237_v13  ;;  %v1980_v13 = vld [vmem:[%s2775_s5 + $0x8] sm:$0xff] (%p228_p2)  }
 0x878   : > { %v1966_v7 = vpop.eup %1965 }
 0x879   : > { %v1251_v16 = vmul.f32 %v1966_v7, %v1250_v8 }
 0x87b   : > { %v1256_v15 = vadd.f32 %v1255_v10, %v1251_v16  ;;  %v1979_v10 = vld [vmem:[%s2775_s5] sm:$0xff] (%p228_p2)  }
 0x87d   : > { %v1262_v19 = vsel %vm1261_vm9, %v1256_v15, %v1253_v49 }
 0x87e   : > { %v1263_v18 = vpack.c.bf16 %v1262_v19, %v1262_v19  ;;  %v1380_v44 = vrot.slane %v1262_v19, 7 }
 0x880   : > { %v1265_v12 = vrot.slane %v1263_v18, 3 }
 0x882   : > { %1300 = vmatmul.mubr.bf16.vlgmr.msra.gmra.mrb[28].mxu0 %v1265_v12  ;;  %1839 = vmatmul.mubr.bf16.vlgmr.msra.gmra.mrb[28].mxu1 %v1265_v12 }
 0x955   : > { %v1301_v4 = vpop.f32.mrb[28].mxu0  ;;  %v1342_v53 = vpop.f32.mrb[28].mxu1 }
 0x956   : > { %v1349_v17 = vrot.slane %v1301_v4, 1  ;;  %v1367_v51 = vrot.slane %v1342_v53, 1  ;;  %v1303_v52 = vpop.f32.mrb[29].mxu0  ;;  %v1840_v5 = vpop.f32.mrb[29].mxu1 }
 0x957   : > { %v1305_v37 = vpop.f32.mrb[30].mxu0  ;;  %v1345_v11 = vpop.f32.mrb[30].mxu1  ;;  %v1359_v41 = vadd.f32 %v1303_v52, %v2192_v36 }
 0x958   : > { %v1351_v54 = vadd.f32 %v1977_v20, %v1349_v17  ;;  %v1369_v56 = vadd.f32 %v1978_v55, %v1367_v51  ;;  %v1306_v58 = vpop.f32.mrb[31].mxu0  ;;  %v1841_v59 = vpop.f32.mrb[31].mxu1 }
 0x959   : > { %v1361_v42 = vrot.slane %v1359_v41, 1 }
 0x95a   : > { %v1352_v60 = vadd.f32 %v1351_v54, %v2469_v14  ;;  %v1370_v62 = vadd.f32 %v1369_v56, %v2412_v57 }
 0x95c   : > { %v1579_v63 = vmul.f32 -1.442695, %v1352_v60  ;;  %v1580_v0 = vmul.f32 -1.442695, %v1370_v62 }
 0x95e   : > { %1967 = vpow2.f32 %v1579_v63 }
 0x95f   : > { %1969 = vpow2.f32 %v1580_v0 }
 0x968   : > { %v1968_v2 = vpop.eup %1967 }
 0x969   : > { %v1970_v38 = vpop.eup %1969  ;;  %v1356_v39 = vadd.f32 1.0, %v1968_v2 }
 0x96a   : > { %v1374_v40 = vadd.f32 1.0, %v1970_v38 }
 0x96b   : > { %1971 = vrcp.f32 %v1356_v39 }
 0x96c   : > { %1973 = vrcp.f32 %v1374_v40 }
 0x975   : > { %v1972_v43 = vpop.eup %1971 }
 0x976   : > { %v1974_v45 = vpop.eup %1973  ;;  %v1363_v14 = vmul.f32 %v1972_v43, %v1361_v42 }
 0x977   : > { %v1382_v46 = vmul.f32 %v1974_v45, %v1380_v44  ;;  %v1377_v47 = vsub.f32 1.0, %v1974_v45 }
 0x978   : > { %v1364_v57 = vadd.f32 %v1363_v14, %v2421_v6  ;;  %v2832_v6 = vmov (%p228_p2), 0.0  }
 0x979   :  { %1842 = vmatprep.subr.bf16.mxu0 (%p228_p2), %v2832_v6  ;;  %1858 = vmatprep.mubr.msk.bf16.mxu0 (%p228_p2), %vm2055_vm0, %v2832_v6 }
 0x97a   : > { %1975 = vtanh.f32 %v1364_v57  ;;  %1843 = vmatpush3.bf16.msra.mxu0 (%p228_p2), %v1979_v10 }
 0x97b   :  { %1844 = vmatprep.subr.bf16.mxu0 (%p228_p2), %v2832_v6 }
 0x97e   :  { %1845 = vmatpush3.bf16.msra.mxu0 (%p228_p2), %v1980_v13 }
 0x97f   :  { %1846 = vmatprep.subr.bf16.mxu0 (%p228_p2), %v2832_v6 }
 0x982   :  { %1847 = vmatpush3.bf16.msra.mxu0 (%p228_p2), %v1981_v21 }
 0x983   :  { %1848 = vmatprep.subr.bf16.mxu0 (%p228_p2), %v2832_v6 }
 0x984   : > { %v1976_v3 = vpop.eup %1975 }
 0x985   : > { %v1378_v48 = vmul.f32 %v1976_v3, %v1377_v47 }
 0x986   :  { %230 = sbr.rel (!%p228_p2) target bundleno = 263 (0x107), region = 68  ;;  %1849 = vmatpush3.bf16.msra.mxu0 (%p228_p2), %v1982_v22 }
 0x987   : > { %v1383_v49 = vadd.f32 %v1382_v46, %v1378_v48  ;;  %1850 = vmatprep.subr.bf16.mxu0 (%p228_p2), %v2832_v6 }
 0x989   : > { %v1389_v50 = vsel %vm1388_vm10, %v1383_v49, %v1380_v44 }
 0x98a   : > { %v1391_v9 = vrot.slane %v1389_v50, 7   ;;  %1851 = vmatpush3.bf16.msra.mxu0 (%p228_p2), %v1983_v23 }
 0x98b   :  { %1852 = vmatprep.subr.bf16.mxu0 (%p228_p2), %v2832_v6 }
 0x98c   : > { %v2831_v37 = vmov %v1391_v9  ;;  %1393 = vst [vmem:[#allocation2] sm:$0x1] (%p228_p2), %v1391_v9  ;;  %v1397_v27 = vpack.c.bf16 (%p228_p2), %v1391_v9, %v1391_v9 }
 0x98e   :  { %1853 = vmatpush3.bf16.msra.mxu0 %v1984_v24 }
 0x98f   :  { %1854 = vmatprep.subr.bf16.mxu0 %v2832_v6 }
 0x992   :  { %1855 = vmatpush3.bf16.msra.mxu0 %v1985_v25 }
 0x993   :  { %1856 = vmatprep.subr.bf16.mxu0 %v2832_v6 }
 0x996   :  { %1857 = vmatpush3.bf16.msra.mxu0 %v1986_v26 }
 0x999   :  { %1859 = vmatmul.mubr.bf16.vlgmr.msra.gmra.mrb[0].mxu0 %v1397_v27 }
 0xa6c   :  { %v1497_v29 = vpop.f32.mrb[0].mxu0 }
 0xa6d   :  { %v1498_v30 = vadd.f32 %v1497_v29, %v1414_v28  ;;  %v1860_v31 = vpop.f32.mrb[1].mxu0 }
 0xa6e   :  { %v1500_v32 = vpop.f32.mrb[2].mxu0 }
 0xa6f   :  { %v1861_v33 = vpop.f32.mrb[3].mxu0  ;;  %1504 = vst.msk [vmem:[#allocation8] sm:$0x1] %vm1503_vm11, %v1498_v30 }
 0xa70   :  { %2020 = shalt.err (!%p2017_p7)
}
 0xa71   :  { %s2021_s16 = scalar_lea.hbm %s2777_s7, 16 }
 0xa72   :  { %p2022_p8 = scmp.ne.s32.totalorder %s2777_s7, %s2021_s16  ;;  %p2025_p9 = scmp.lt.u32.totalorder %s2021_s16, %s2777_s7 }
 0xa74   :  { %p2027_p10 = pnand %p2025_p9, %p2022_p8 }
 0xa76   :  { %2030 = shalt.err (!%p2027_p10)
}
 0xa77   :  { %1514 = dma.vmem_to_hbm [thread:$0]  %s1512_s13, 16, %s2777_s7, [#allocation7]  }
 0xa78   :  { %2041 = dma.done.wait [#allocation7], 16  }
 0xa79   :  { %2042 = vsyncadd [#allocation7], 4294967280 }
 0xa7a   :  { %1518 = vsyncpa [#allocation6], 1 }
 0xa7b   :  { %1519 = vsyncpa [#allocation7], 1 }

</bundles_post_ra>
